<compile_context>
chip_gen: v5e
topology: v5e:2x2
jax: 0.10.0
libtpu: 0.0.40
codegen_flags: <defaults>
</compile_context>

<pallas_src>
import functools
import math

import jax
import jax.numpy as jnp
from jax.experimental import pallas as pl
from jax.experimental.pallas import tpu as pltpu


# ---------------------------------------------------------------------------
# helpers
# ---------------------------------------------------------------------------
def _pick_tile(extent, max_tile, *, multiple=8, prefer_two_steps=True):
    """Largest divisor of `extent` that is <= max_tile and a multiple of
    `multiple` (or the full extent).  Optionally back off so the grid has at
    least two steps (keeps both v7x TensorCores busy)."""
    divisors = [d for d in range(1, extent + 1) if extent % d == 0]
    ok = [d for d in divisors
          if d <= max_tile and (d % multiple == 0 or d == extent)]
    tile = max(ok) if ok else extent
    if prefer_two_steps and tile == extent and extent >= 2:
        halves = [d for d in ok if d <= extent // 2]
        if halves:
            tile = max(halves)
    return tile


def _vmem_limit(words_f32):
    """Scoped-VMEM request: >= the 32 MiB default, <= v7x's 64 MiB physical."""
    need = 4 * (4 * words_f32)          # 4x headroom for tile padding / scratch
    return int(min(64 * 1024 * 1024, max(32 * 1024 * 1024, need)))


# ---------------------------------------------------------------------------
# kernel 1: batched row-tiled linear layer   y[s] = x[s] @ w[s] + b[s]
# ---------------------------------------------------------------------------
def _batched_linear_kernel(x_ref, w_ref, b_ref, o_ref):
    x = x_ref[0]                                   # (tr, Cin)
    w = w_ref[0]                                   # (Cin, Cout), grid-invariant
    y = jnp.dot(x, w, preferred_element_type=jnp.float32) + b_ref[0]
    o_ref[0] = y.astype(o_ref.dtype)


def _batched_linear(x, w, b, *, max_rows=1024):
    """x: (S, R, Cin), w: (S, Cin, Cout), b: (S, 1, Cout) -> (S, R, Cout)."""
    S, R, Cin = x.shape
    Cout = w.shape[-1]
    tr = _pick_tile(R, max_rows, multiple=8, prefer_two_steps=(S == 1))
    grid = (S, R // tr)
    vmem = _vmem_limit(2 * tr * (Cin + Cout) + 2 * Cin * Cout + Cout)
    return pl.pallas_call(
        _batched_linear_kernel,
        out_shape=jax.ShapeDtypeStruct((S, R, Cout), x.dtype),
        grid_spec=pltpu.PrefetchScalarGridSpec(
            num_scalar_prefetch=0,
            grid=grid,
            in_specs=[
                pl.BlockSpec((1, tr, Cin), lambda s, i: (s, i, 0)),
                pl.BlockSpec((1, Cin, Cout), lambda s, i: (s, 0, 0)),
                pl.BlockSpec((1, 1, Cout), lambda s, i: (s, 0, 0)),
            ],
            out_specs=pl.BlockSpec((1, tr, Cout), lambda s, i: (s, i, 0)),
        ),
        compiler_params=pltpu.CompilerParams(
            dimension_semantics=("parallel", "parallel"),
            vmem_limit_bytes=vmem),
    )(x, w, b)


# ---------------------------------------------------------------------------
# kernel 2: batched scaled-dot-product attention over the group axis
#           groups = flattened (B, heads, T); attention mixes the N axis
# ---------------------------------------------------------------------------
def _sdpa_kernel(q_ref, k_ref, v_ref, o_ref, *, scale):
    q = q_ref[...]                                 # (gb, N, D)
    k = k_ref[...]
    v = v_ref[...]
    s = jnp.einsum("gnd,gmd->gnm", q, k,
                   preferred_element_type=jnp.float32) * scale
    s = s - jnp.max(s, axis=-1, keepdims=True)     # stable softmax over keys
    p = jnp.exp(s)
    p = p / jnp.sum(p, axis=-1, keepdims=True)
    ctx = jnp.einsum("gnm,gmd->gnd", p.astype(v.dtype), v,
                     preferred_element_type=jnp.float32)
    o_ref[...] = ctx.astype(o_ref.dtype)


def _sdpa(q, k, v, *, scale, max_groups=512):
    Gt, N, D = q.shape
    gb = _pick_tile(Gt, max_groups, multiple=1, prefer_two_steps=True)
    grid = (Gt // gb,)
    blk = lambda: pl.BlockSpec((gb, N, D), lambda i: (i, 0, 0))
    vmem = _vmem_limit(8 * gb * N * D + 3 * gb * N * N)
    return pl.pallas_call(
        functools.partial(_sdpa_kernel, scale=scale),
        out_shape=jax.ShapeDtypeStruct((Gt, N, D), q.dtype),
        grid_spec=pltpu.PrefetchScalarGridSpec(
            num_scalar_prefetch=0,
            grid=grid,
            in_specs=[blk(), blk(), blk()],
            out_specs=blk(),
        ),
        compiler_params=pltpu.CompilerParams(
            dimension_semantics=("parallel",),
            vmem_limit_bytes=vmem),
    )(q, k, v)


# ---------------------------------------------------------------------------
# full forward
# ---------------------------------------------------------------------------
def smha_forward(params, input_Q, input_K, input_V, *, heads,
                 max_rows_per_block=1024, max_groups_per_block=512):
    B, N, T, C = input_Q.shape
    assert C % heads == 0, "embed_size must be divisible by heads"
    D = C // heads
    E = params["wo"].shape[-1]
    rows = B * N * T

    # 1) Q/K/V projections: a single pallas_call, the three linears stacked
    #    on a leading S=3 axis (no bias in the PyTorch module).
    x3 = jnp.stack([input_Q.reshape(rows, C),
                    input_K.reshape(rows, C),
                    input_V.reshape(rows, C)], axis=0)               # (3, rows, C)
    w3 = jnp.stack([params["wq"], params["wk"], params["wv"]], axis=0)
    b3 = jnp.zeros((3, 1, C), input_Q.dtype)
    qkv = _batched_linear(x3, w3, b3, max_rows=max_rows_per_block)   # (3, rows, C)

    # 2) scaled-dot-product attention over the N ("node") axis per (b, h, t).
    def to_heads(y2d):
        # (B*N*T, C) -> (B, N, T, H, D) -> (B, H, T, N, D) -> (B*H*T, N, D)
        return (y2d.reshape(B, N, T, heads, D)
                   .transpose(0, 3, 2, 1, 4)
                   .reshape(B * heads * T, N, D))

    ctx = _sdpa(to_heads(qkv[0]), to_heads(qkv[1]), to_heads(qkv[2]),
                scale=1.0 / math.sqrt(D),
                max_groups=max_groups_per_block)                     # (B*H*T, N, D)

    # 3) merge heads back and apply fc_out (with bias).
    ctx2 = (ctx.reshape(B, heads, T, N, D)
               .transpose(0, 3, 2, 1, 4)                             # (B, N, T, H, D)
               .reshape(rows, heads * D))                            # (rows, C)
    out = _batched_linear(ctx2[None], params["wo"][None],
                          params["bo"].reshape(1, 1, E),
                          max_rows=max_rows_per_block)[0]            # (rows, E)
    return out.reshape(B, N, T, E)


# ---------------------------------------------------------------------------
# parameter init (PyTorch-default-style) and pure-JAX reference
# ---------------------------------------------------------------------------
def init_params(rng, embed_size, heads):
    """Linear weights stored as (in, out) = W_pytorch.T so kernels do x @ W."""
    C = embed_size
    assert C % heads == 0
    kq, kk, kv, kw, kb = jax.random.split(rng, 5)
    lim = 1.0 / math.sqrt(C)
    u = lambda k, shape: jax.random.uniform(k, shape, jnp.float32, -lim, lim)
    return {
        "wq": u(kq, (C, C)),
        "wk": u(kk, (C, C)),
        "wv": u(kv, (C, C)),
        "wo": u(kw, (C, C)),          # fc_out: (heads*head_dim, embed_size)
        "bo": u(kb, (C,)),
    }


def _reference(params, input_Q, input_K, input_V, heads):
    B, N, T, C = input_Q.shape
    D = C // heads
    with jax.default_matmul_precision("highest"):
        Q = (input_Q @ params["wq"]).reshape(B, N, T, heads, D).transpose(0, 3, 2, 1, 4)
        K = (input_K @ params["wk"]).reshape(B, N, T, heads, D).transpose(0, 3, 2, 1, 4)
        V = (input_V @ params["wv"]).reshape(B, N, T, heads, D).transpose(0, 3, 2, 1, 4)
        s = jnp.einsum("bhtnd,bhtmd->bhtnm", Q, K) / math.sqrt(D)
        p = jax.nn.softmax(s, axis=-1)
        ctx = jnp.einsum("bhtnm,bhtmd->bhtnd", p, V)
        ctx = ctx.transpose(0, 3, 2, 1, 4).reshape(B, N, T, heads * D)
        return ctx @ params["wo"] + params["bo"]


if __name__ == "__main__":
    # Small shapes consistent with the module: inputs are (B, N, T, embed_size).
    B, N, T = 2, 4, 8
    embed_size, heads = 32, 4

    root = jax.random.PRNGKey(0)
    kp, kq, kk, kv = jax.random.split(root, 4)
    params = init_params(kp, embed_size, heads)
    input_Q = jax.random.normal(kq, (B, N, T, embed_size), jnp.float32)
    input_K = jax.random.normal(kk, (B, N, T, embed_size), jnp.float32)
    input_V = jax.random.normal(kv, (B, N, T, embed_size), jnp.float32)

    fwd = jax.jit(functools.partial(smha_forward, heads=heads))
    out = jax.block_until_ready(fwd(params, input_Q, input_K, input_V))

    ref = _reference(params, input_Q, input_K, input_V, heads)
    assert out.shape == (B, N, T, embed_size)
    assert jnp.allclose(out, ref, atol=1e-3, rtol=1e-3), "mismatch vs reference"
    print("KERNEL_OK")
</pallas_src>

<mosaic_0001>
module attributes {stable_mosaic.version = 11 : i64} {
  func.func @_batched_linear_kernel(%arg0: i32, %arg1: i32, %arg2: memref<1x64x32xf32, #tpu.memory_space<vmem>>, %arg3: memref<1x32x32xf32, #tpu.memory_space<vmem>>, %arg4: memref<1x1x32xf32, #tpu.memory_space<vmem>>, %arg5: memref<1x64x32xf32, #tpu.memory_space<vmem>>) attributes {dimension_semantics = [#tpu.dimension_semantics<parallel>, #tpu.dimension_semantics<parallel>], iteration_bounds = array<i64: 3, 1>, scalar_prefetch = 0 : i64, scratch_operands = 0 : i64, tpu.core_type = #tpu.core_type<tc>, window_params = [{transform_indices = @transform_0, window_bounds = array<i64: 1, 64, 32>}, {transform_indices = @transform_1, window_bounds = array<i64: 1, 32, 32>}, {transform_indices = @transform_2, window_bounds = array<i64: 1, 1, 32>}, {transform_indices = @transform_3, window_bounds = array<i64: 1, 64, 32>}]} {
    %c0 = arith.constant 0 : index
    %c0_0 = arith.constant 0 : index
    %c0_1 = arith.constant 0 : index
    %0 = vector.load %arg2[%c0, %c0_0, %c0_1] : memref<1x64x32xf32, #tpu.memory_space<vmem>>, vector<1x64x32xf32>
    %1 = vector.shape_cast %0 : vector<1x64x32xf32> to vector<64x32xf32>
    %c0_2 = arith.constant 0 : index
    %c0_3 = arith.constant 0 : index
    %c0_4 = arith.constant 0 : index
    %2 = vector.load %arg3[%c0_2, %c0_3, %c0_4] : memref<1x32x32xf32, #tpu.memory_space<vmem>>, vector<1x32x32xf32>
    %3 = vector.shape_cast %2 : vector<1x32x32xf32> to vector<32x32xf32>
    %cst = arith.constant dense<0.000000e+00> : vector<64x32xf32>
    %4 = tpu.matmul %1, %3, %cst {dimension_numbers = #tpu.dot_dimension_numbers<[1], [0], [0], [1], [0, 0, 1, 1], [], []>} : vector<64x32xf32>, vector<32x32xf32>, vector<64x32xf32> -> vector<64x32xf32>
    %c0_5 = arith.constant 0 : index
    %c0_6 = arith.constant 0 : index
    %c0_7 = arith.constant 0 : index
    %5 = vector.load %arg4[%c0_5, %c0_6, %c0_7] : memref<1x1x32xf32, #tpu.memory_space<vmem>>, vector<1x1x32xf32>
    %6 = vector.shape_cast %5 : vector<1x1x32xf32> to vector<1x32xf32>
    %7 = vector.broadcast %6 : vector<1x32xf32> to vector<64x32xf32>
    %8 = arith.addf %4, %7 : vector<64x32xf32>
    %c0_8 = arith.constant 0 : index
    %c0_9 = arith.constant 0 : index
    %c0_10 = arith.constant 0 : index
    %9 = vector.load %arg5[%c0_8, %c0_9, %c0_10] : memref<1x64x32xf32, #tpu.memory_space<vmem>>, vector<1x64x32xf32>
    %10 = vector.shape_cast %9 : vector<1x64x32xf32> to vector<64x32xf32>
    %11 = vector.shape_cast %8 : vector<64x32xf32> to vector<1x64x32xf32>
    tpu.vector_store %arg5[%c0_8, %c0_9, %c0_10], %11 {strides = array<i32>} : memref<1x64x32xf32, #tpu.memory_space<vmem>>, vector<1x64x32xf32>,
    return
  }
  func.func @transform_0(%arg0: i32, %arg1: i32) -> (i32, i32, i32) {
    %c0_i32 = arith.constant 0 : i32
    %c0_i32_0 = arith.constant 0 : i32
    return %arg0, %arg1, %c0_i32 : i32, i32, i32
  }
  func.func @transform_1(%arg0: i32, %arg1: i32) -> (i32, i32, i32) {
    %c0_i32 = arith.constant 0 : i32
    %c0_i32_0 = arith.constant 0 : i32
    %c0_i32_1 = arith.constant 0 : i32
    return %arg0, %c0_i32, %c0_i32_0 : i32, i32, i32
  }
  func.func @transform_2(%arg0: i32, %arg1: i32) -> (i32, i32, i32) {
    %c0_i32 = arith.constant 0 : i32
    %c0_i32_0 = arith.constant 0 : i32
    %c0_i32_1 = arith.constant 0 : i32
    return %arg0, %c0_i32, %c0_i32_0 : i32, i32, i32
  }
  func.func @transform_3(%arg0: i32, %arg1: i32) -> (i32, i32, i32) {
    %c0_i32 = arith.constant 0 : i32
    %c0_i32_0 = arith.constant 0 : i32
    return %arg0, %arg1, %c0_i32 : i32, i32, i32
  }
}

module attributes {stable_mosaic.version = 11 : i64} {
  func.func @_sdpa_kernel(%arg0: i32, %arg1: memref<32x4x8xf32, #tpu.memory_space<vmem>>, %arg2: memref<32x4x8xf32, #tpu.memory_space<vmem>>, %arg3: memref<32x4x8xf32, #tpu.memory_space<vmem>>, %arg4: memref<32x4x8xf32, #tpu.memory_space<vmem>>) attributes {dimension_semantics = [#tpu.dimension_semantics<parallel>], iteration_bounds = array<i64: 2>, scalar_prefetch = 0 : i64, scratch_operands = 0 : i64, tpu.core_type = #tpu.core_type<tc>, window_params = [{transform_indices = @transform_0, window_bounds = array<i64: 32, 4, 8>}, {transform_indices = @transform_1, window_bounds = array<i64: 32, 4, 8>}, {transform_indices = @transform_2, window_bounds = array<i64: 32, 4, 8>}, {transform_indices = @transform_3, window_bounds = array<i64: 32, 4, 8>}]} {
    %c0 = arith.constant 0 : index
    %c0_0 = arith.constant 0 : index
    %c0_1 = arith.constant 0 : index
    %0 = vector.load %arg1[%c0, %c0_0, %c0_1] : memref<32x4x8xf32, #tpu.memory_space<vmem>>, vector<32x4x8xf32>
    %c0_2 = arith.constant 0 : index
    %c0_3 = arith.constant 0 : index
    %c0_4 = arith.constant 0 : index
    %1 = vector.load %arg2[%c0_2, %c0_3, %c0_4] : memref<32x4x8xf32, #tpu.memory_space<vmem>>, vector<32x4x8xf32>
    %c0_5 = arith.constant 0 : index
    %c0_6 = arith.constant 0 : index
    %c0_7 = arith.constant 0 : index
    %2 = vector.load %arg3[%c0_5, %c0_6, %c0_7] : memref<32x4x8xf32, #tpu.memory_space<vmem>>, vector<32x4x8xf32>
    "tpu.trace_start"() <{level = 10 : i32, message = "gnd,gmd->gnm"}> : () -> ()
    %cst = arith.constant dense<0.000000e+00> : vector<32x4x4xf32>
    %3 = tpu.matmul %0, %1, %cst {dimension_numbers = #tpu.dot_dimension_numbers<[2], [2], [1], [1], [0, 0, 0, 1, 1, 1], [0], [0]>} : vector<32x4x8xf32>, vector<32x4x8xf32>, vector<32x4x4xf32> -> vector<32x4x4xf32>
    "tpu.trace_stop"() : () -> ()
    %cst_8 = arith.constant 0.353553385 : f32
    %4 = vector.broadcast %cst_8 : f32 to vector<32x4x4xf32>
    %5 = arith.mulf %3, %4 : vector<32x4x4xf32>
    %cst_9 = arith.constant dense<0xFF800000> : vector<32x4xf32>
    %6 = vector.multi_reduction <maximumf>, %5, %cst_9 [2] : vector<32x4x4xf32> to vector<32x4xf32>
    %7 = vector.shape_cast %6 : vector<32x4xf32> to vector<32x4x1xf32>
    %8 = vector.broadcast %7 : vector<32x4x1xf32> to vector<32x4x4xf32>
    %9 = arith.subf %5, %8 : vector<32x4x4xf32>
    %10 = math.exp %9 : vector<32x4x4xf32>
    %cst_10 = arith.constant dense<0.000000e+00> : vector<32x4xf32>
    %11 = vector.multi_reduction <add>, %10, %cst_10 [2] : vector<32x4x4xf32> to vector<32x4xf32>
    %12 = vector.shape_cast %11 : vector<32x4xf32> to vector<32x4x1xf32>
    %13 = vector.broadcast %12 : vector<32x4x1xf32> to vector<32x4x4xf32>
    %14 = arith.divf %10, %13 : vector<32x4x4xf32>
    "tpu.trace_start"() <{level = 10 : i32, message = "gnm,gmd->gnd"}> : () -> ()
    %cst_11 = arith.constant dense<0.000000e+00> : vector<32x4x8xf32>
    %15 = tpu.matmul %14, %2, %cst_11 {dimension_numbers = #tpu.dot_dimension_numbers<[2], [1], [1], [2], [0, 0, 0, 1, 1, 2], [0], [0]>} : vector<32x4x4xf32>, vector<32x4x8xf32>, vector<32x4x8xf32> -> vector<32x4x8xf32>
    "tpu.trace_stop"() : () -> ()
    %c0_12 = arith.constant 0 : index
    %c0_13 = arith.constant 0 : index
    %c0_14 = arith.constant 0 : index
    %16 = vector.load %arg4[%c0_12, %c0_13, %c0_14] : memref<32x4x8xf32, #tpu.memory_space<vmem>>, vector<32x4x8xf32>
    tpu.vector_store %arg4[%c0_12, %c0_13, %c0_14], %15 {strides = array<i32>} : memref<32x4x8xf32, #tpu.memory_space<vmem>>, vector<32x4x8xf32>,
    return
  }
  func.func @transform_0(%arg0: i32) -> (i32, i32, i32) {
    %c0_i32 = arith.constant 0 : i32
    %c0_i32_0 = arith.constant 0 : i32
    %c0_i32_1 = arith.constant 0 : i32
    return %arg0, %c0_i32, %c0_i32_0 : i32, i32, i32
  }
  func.func @transform_1(%arg0: i32) -> (i32, i32, i32) {
    %c0_i32 = arith.constant 0 : i32
    %c0_i32_0 = arith.constant 0 : i32
    %c0_i32_1 = arith.constant 0 : i32
    return %arg0, %c0_i32, %c0_i32_0 : i32, i32, i32
  }
  func.func @transform_2(%arg0: i32) -> (i32, i32, i32) {
    %c0_i32 = arith.constant 0 : i32
    %c0_i32_0 = arith.constant 0 : i32
    %c0_i32_1 = arith.constant 0 : i32
    return %arg0, %c0_i32, %c0_i32_0 : i32, i32, i32
  }
  func.func @transform_3(%arg0: i32) -> (i32, i32, i32) {
    %c0_i32 = arith.constant 0 : i32
    %c0_i32_0 = arith.constant 0 : i32
    %c0_i32_1 = arith.constant 0 : i32
    return %arg0, %c0_i32, %c0_i32_0 : i32, i32, i32
  }
}

module attributes {stable_mosaic.version = 11 : i64} {
  func.func @_batched_linear_kernel(%arg0: i32, %arg1: i32, %arg2: memref<1x32x32xf32, #tpu.memory_space<vmem>>, %arg3: memref<1x32x32xf32, #tpu.memory_space<vmem>>, %arg4: memref<1x1x32xf32, #tpu.memory_space<vmem>>, %arg5: memref<1x32x32xf32, #tpu.memory_space<vmem>>) attributes {dimension_semantics = [#tpu.dimension_semantics<parallel>, #tpu.dimension_semantics<parallel>], iteration_bounds = array<i64: 1, 2>, scalar_prefetch = 0 : i64, scratch_operands = 0 : i64, tpu.core_type = #tpu.core_type<tc>, window_params = [{transform_indices = @transform_0, window_bounds = array<i64: 1, 32, 32>}, {transform_indices = @transform_1, window_bounds = array<i64: 1, 32, 32>}, {transform_indices = @transform_2, window_bounds = array<i64: 1, 1, 32>}, {transform_indices = @transform_3, window_bounds = array<i64: 1, 32, 32>}]} {
    %c0 = arith.constant 0 : index
    %c0_0 = arith.constant 0 : index
    %c0_1 = arith.constant 0 : index
    %0 = vector.load %arg2[%c0, %c0_0, %c0_1] : memref<1x32x32xf32, #tpu.memory_space<vmem>>, vector<1x32x32xf32>
    %1 = vector.shape_cast %0 : vector<1x32x32xf32> to vector<32x32xf32>
    %c0_2 = arith.constant 0 : index
    %c0_3 = arith.constant 0 : index
    %c0_4 = arith.constant 0 : index
    %2 = vector.load %arg3[%c0_2, %c0_3, %c0_4] : memref<1x32x32xf32, #tpu.memory_space<vmem>>, vector<1x32x32xf32>
    %3 = vector.shape_cast %2 : vector<1x32x32xf32> to vector<32x32xf32>
    %cst = arith.constant dense<0.000000e+00> : vector<32x32xf32>
    %4 = tpu.matmul %1, %3, %cst {dimension_numbers = #tpu.dot_dimension_numbers<[1], [0], [0], [1], [0, 0, 1, 1], [], []>} : vector<32x32xf32>, vector<32x32xf32>, vector<32x32xf32> -> vector<32x32xf32>
    %c0_5 = arith.constant 0 : index
    %c0_6 = arith.constant 0 : index
    %c0_7 = arith.constant 0 : index
    %5 = vector.load %arg4[%c0_5, %c0_6, %c0_7] : memref<1x1x32xf32, #tpu.memory_space<vmem>>, vector<1x1x32xf32>
    %6 = vector.shape_cast %5 : vector<1x1x32xf32> to vector<1x32xf32>
    %7 = vector.broadcast %6 : vector<1x32xf32> to vector<32x32xf32>
    %8 = arith.addf %4, %7 : vector<32x32xf32>
    %c0_8 = arith.constant 0 : index
    %c0_9 = arith.constant 0 : index
    %c0_10 = arith.constant 0 : index
    %9 = vector.load %arg5[%c0_8, %c0_9, %c0_10] : memref<1x32x32xf32, #tpu.memory_space<vmem>>, vector<1x32x32xf32>
    %10 = vector.shape_cast %9 : vector<1x32x32xf32> to vector<32x32xf32>
    %11 = vector.shape_cast %8 : vector<32x32xf32> to vector<1x32x32xf32>
    tpu.vector_store %arg5[%c0_8, %c0_9, %c0_10], %11 {strides = array<i32>} : memref<1x32x32xf32, #tpu.memory_space<vmem>>, vector<1x32x32xf32>,
    return
  }
  func.func @transform_0(%arg0: i32, %arg1: i32) -> (i32, i32, i32) {
    %c0_i32 = arith.constant 0 : i32
    %c0_i32_0 = arith.constant 0 : i32
    return %arg0, %arg1, %c0_i32 : i32, i32, i32
  }
  func.func @transform_1(%arg0: i32, %arg1: i32) -> (i32, i32, i32) {
    %c0_i32 = arith.constant 0 : i32
    %c0_i32_0 = arith.constant 0 : i32
    %c0_i32_1 = arith.constant 0 : i32
    return %arg0, %c0_i32, %c0_i32_0 : i32, i32, i32
  }
  func.func @transform_2(%arg0: i32, %arg1: i32) -> (i32, i32, i32) {
    %c0_i32 = arith.constant 0 : i32
    %c0_i32_0 = arith.constant 0 : i32
    %c0_i32_1 = arith.constant 0 : i32
    return %arg0, %c0_i32, %c0_i32_0 : i32, i32, i32
  }
  func.func @transform_3(%arg0: i32, %arg1: i32) -> (i32, i32, i32) {
    %c0_i32 = arith.constant 0 : i32
    %c0_i32_0 = arith.constant 0 : i32
    return %arg0, %arg1, %c0_i32 : i32, i32, i32
  }
}

</mosaic_0001>

<bundles_post_ra>
// kernel: squeeze.4
= control target key start
LH: loop header
LB: loop body
LE: loop exit
PB: predicated region body
PF: predicated region fallthrough
CT: control target
= control target key end

     0   :  { %s876_s10 = smov 120   ;;  %s877_s11 = smov 112   ;;  %vm3_vm0 = vcmask 64512   ;;  %s1231_s0 = inlined_call_operand.vmem [shape: f32[1,64,32], index: 0, kind: input, shape index: {}]   ;;  %s1232_s1 = inlined_call_operand.vmem [shape: f32[2,4,8,4,8], index: 1, kind: output, shape index: {}]  }
   0x1   :  { %v786_v0 = vld [vmem:[%s1231_s0 + $0x10] sm:$0xff]   ;;  %v41_v1 = vld [vmem:[%s1231_s0] sm:$0xff]   ;;  %v787_v2 = vld [vmem:[%s1231_s0 + $0x18] sm:$0xff]   ;;  %s879_s16 = smov 96   ;;  %s880_s17 = smov 88  }
   0x2   :  { %68 = vrot.lane.b32.xlu1 %v786_v0, %s876_s10  ;;  %42 = vrot.lane.b32.xlu0 %v41_v1, %s876_s10  ;;  %v785_v3 = vld [vmem:[%s1231_s0 + $0x8] sm:$0xff]   ;;  %s878_s0 = smov 104   ;;  %s881_s18 = smov 80   ;;  %4 = vst.msk [vmem:[#allocation0] ss:$16 sm:$0x3] %vm3_vm0, %v41_v1  }
   0x3   :  { %93 = vrot.lane.b32.xlu2 %v41_v1, %s877_s11  ;;  %6 = vst.msk [vmem:[#allocation0] ss:$16 sm:$0x30] %vm3_vm0, %v41_v1   ;;  %s882_s19 = smov 72  }
   0x4   :  { %5 = vst.msk [vmem:[#allocation0] ss:$16 sm:$0xc] %vm3_vm0, %v41_v1  }
   0x5   :  { %7 = vst.msk [vmem:[#allocation0] ss:$16 sm:$0xc0] %vm3_vm0, %v41_v1  }
   0x6   :  { %12 = vst.msk [vmem:[#allocation0 + $0x80] ss:$16 sm:$0x3] %vm3_vm0, %v785_v3  }
   0x7   :  { %14 = vst.msk [vmem:[#allocation0 + $0x80] ss:$16 sm:$0xc] %vm3_vm0, %v785_v3  }
   0x8   :  { %16 = vst.msk [vmem:[#allocation0 + $0x80] ss:$16 sm:$0x30] %vm3_vm0, %v785_v3  }
   0x9   :  { %18 = vst.msk [vmem:[#allocation0 + $0x80] ss:$16 sm:$0xc0] %vm3_vm0, %v785_v3  }
   0xa   :  { %81 = vrot.lane.b32.xlu1 %v787_v2, %s876_s10  ;;  %55 = vrot.lane.b32.xlu0 %v785_v3, %s876_s10  ;;  %29 = vst.msk [vmem:[#allocation0 + $0x100] ss:$16 sm:$0xc0] %vm3_vm0, %v786_v0  }
   0xb   :  { %106 = vrot.lane.b32.xlu2 %v785_v3, %s877_s11  ;;  %23 = vst.msk [vmem:[#allocation0 + $0x100] ss:$16 sm:$0x3] %vm3_vm0, %v786_v0  }
   0xc   :  { %25 = vst.msk [vmem:[#allocation0 + $0x100] ss:$16 sm:$0xc] %vm3_vm0, %v786_v0  }
   0xd   :  { %27 = vst.msk [vmem:[#allocation0 + $0x100] ss:$16 sm:$0x30] %vm3_vm0, %v786_v0  }
   0xe   :  { %34 = vst.msk [vmem:[#allocation0 + $0x180] ss:$16 sm:$0x3] %vm3_vm0, %v787_v2  }
   0xf   :  { %36 = vst.msk [vmem:[#allocation0 + $0x180] ss:$16 sm:$0xc] %vm3_vm0, %v787_v2  }
  0x10   :  { %38 = vst.msk [vmem:[#allocation0 + $0x180] ss:$16 sm:$0x30] %vm3_vm0, %v787_v2  }
  0x11   :  { %40 = vst.msk [vmem:[#allocation0 + $0x180] ss:$16 sm:$0xc0] %vm3_vm0, %v787_v2  }
  0x12   :  { %132 = vrot.lane.b32.xlu1 %v787_v2, %s877_s11  ;;  %119 = vrot.lane.b32.xlu0 %v786_v0, %s877_s11 }
  0x13   :  { %144 = vrot.lane.b32.xlu2 %v41_v1, %s878_s0 }
  0x1a   :  { %170 = vrot.lane.b32.xlu1 %v786_v0, %s878_s0  ;;  %157 = vrot.lane.b32.xlu0 %v785_v3, %s878_s0 }
  0x1b   :  { %183 = vrot.lane.b32.xlu2 %v787_v2, %s878_s0 }
  0x22   :  { %208 = vrot.lane.b32.xlu1 %v785_v3, %s879_s16  ;;  %195 = vrot.lane.b32.xlu0 %v41_v1, %s879_s16 }
  0x23   :  { %221 = vrot.lane.b32.xlu2 %v786_v0, %s879_s16 }
  0x2a   :  { %246 = vrot.lane.b32.xlu1 %v41_v1, %s880_s17  ;;  %234 = vrot.lane.b32.xlu0 %v787_v2, %s879_s16 }
  0x2b   :  { %259 = vrot.lane.b32.xlu2 %v785_v3, %s880_s17 }
  0x32   :  { %285 = vrot.lane.b32.xlu1 %v787_v2, %s880_s17  ;;  %272 = vrot.lane.b32.xlu0 %v786_v0, %s880_s17 }
  0x33   :  { %297 = vrot.lane.b32.xlu2 %v41_v1, %s881_s18 }
  0x3a   :  { %323 = vrot.lane.b32.xlu1 %v786_v0, %s881_s18  ;;  %310 = vrot.lane.b32.xlu0 %v785_v3, %s881_s18 }
  0x3b   :  { %336 = vrot.lane.b32.xlu2 %v787_v2, %s881_s18 }
  0x42   :  { %361 = vrot.lane.b32.xlu1 %v785_v3, %s882_s19  ;;  %348 = vrot.lane.b32.xlu0 %v41_v1, %s882_s19 }
  0x43   :  { %374 = vrot.lane.b32.xlu2 %v786_v0, %s882_s19 }
  0x4a   :  { %387 = vrot.lane.b32.xlu0 %v787_v2, %s882_s19 }
  0x5d   :  { %v94_v4 = vpop.permute.xlu2 %93  }
  0x5e   :  { %97 = vst.msk [vmem:[#allocation0 + $0x2] ss:$16 sm:$0x3] %vm3_vm0, %v94_v4  }
  0x5f   :  { %99 = vst.msk [vmem:[#allocation0 + $0x2] ss:$16 sm:$0xc] %vm3_vm0, %v94_v4  }
  0x60   :  { %101 = vst.msk [vmem:[#allocation0 + $0x2] ss:$16 sm:$0x30] %vm3_vm0, %v94_v4  }
  0x61   :  { %103 = vst.msk [vmem:[#allocation0 + $0x2] ss:$16 sm:$0xc0] %vm3_vm0, %v94_v4  }
  0x65   :  { %v107_v5 = vpop.permute.xlu2 %106  }
  0x66   :  { %110 = vst.msk [vmem:[#allocation0 + $0x82] ss:$16 sm:$0x3] %vm3_vm0, %v107_v5  }
  0x67   :  { %112 = vst.msk [vmem:[#allocation0 + $0x82] ss:$16 sm:$0xc] %vm3_vm0, %v107_v5  }
  0x68   :  { %114 = vst.msk [vmem:[#allocation0 + $0x82] ss:$16 sm:$0x30] %vm3_vm0, %v107_v5  }
  0x69   :  { %116 = vst.msk [vmem:[#allocation0 + $0x82] ss:$16 sm:$0xc0] %vm3_vm0, %v107_v5  }
  0x6d   :  { %v145_v6 = vpop.permute.xlu2 %144  }
  0x6e   :  { %148 = vst.msk [vmem:[#allocation0 + $0x3] ss:$16 sm:$0x3] %vm3_vm0, %v145_v6  }
  0x6f   :  { %150 = vst.msk [vmem:[#allocation0 + $0x3] ss:$16 sm:$0xc] %vm3_vm0, %v145_v6  }
  0x70   :  { %152 = vst.msk [vmem:[#allocation0 + $0x3] ss:$16 sm:$0x30] %vm3_vm0, %v145_v6  }
  0x71   :  { %154 = vst.msk [vmem:[#allocation0 + $0x3] ss:$16 sm:$0xc0] %vm3_vm0, %v145_v6  }
  0x74   :  { %v69_v7 = vpop.permute.xlu1 %68   ;;  %v43_v8 = vpop.permute.xlu0 %42  }
  0x75   :  { %72 = vst.msk [vmem:[#allocation0 + $0x101] ss:$16 sm:$0x3] %vm3_vm0, %v69_v7   ;;  %v184_v9 = vpop.permute.xlu2 %183  }
  0x76   :  { %74 = vst.msk [vmem:[#allocation0 + $0x101] ss:$16 sm:$0xc] %vm3_vm0, %v69_v7  }
  0x77   :  { %76 = vst.msk [vmem:[#allocation0 + $0x101] ss:$16 sm:$0x30] %vm3_vm0, %v69_v7  }
  0x78   :  { %78 = vst.msk [vmem:[#allocation0 + $0x101] ss:$16 sm:$0xc0] %vm3_vm0, %v69_v7  }
  0x79   :  { %46 = vst.msk [vmem:[#allocation0 + $0x1] ss:$16 sm:$0x3] %vm3_vm0, %v43_v8  }
  0x7a   :  { %48 = vst.msk [vmem:[#allocation0 + $0x1] ss:$16 sm:$0xc] %vm3_vm0, %v43_v8  }
  0x7b   :  { %50 = vst.msk [vmem:[#allocation0 + $0x1] ss:$16 sm:$0x30] %vm3_vm0, %v43_v8  }
  0x7c   :  { %52 = vst.msk [vmem:[#allocation0 + $0x1] ss:$16 sm:$0xc0] %vm3_vm0, %v43_v8   ;;  %v82_v10 = vpop.permute.xlu1 %81   ;;  %v56_v11 = vpop.permute.xlu0 %55  }
  0x7d   :  { %85 = vst.msk [vmem:[#allocation0 + $0x181] ss:$16 sm:$0x3] %vm3_vm0, %v82_v10   ;;  %v222_v15 = vpop.permute.xlu2 %221  }
  0x7e   :  { %87 = vst.msk [vmem:[#allocation0 + $0x181] ss:$16 sm:$0xc] %vm3_vm0, %v82_v10  }
  0x7f   :  { %89 = vst.msk [vmem:[#allocation0 + $0x181] ss:$16 sm:$0x30] %vm3_vm0, %v82_v10  }
  0x80   :  { %v400_v12 = vld [vmem:[#allocation0] sm:$0xf]  ;;  %v411_v13 = vld [vmem:[#allocation0 + $0x10] sm:$0xf] }
  0x81   :  { %v423_v14 = vld [vmem:[#allocation0 + $0x20] sm:$0xf]  ;;  %403 = vst [vmem:[%s1232_s1] sm:$0xf] %v400_v12  ;;  %v435_v18 = vld [vmem:[#allocation0 + $0x30] sm:$0xf] }
  0x82   :  { %807 = vst [vmem:[%s1232_s1 + $0x8] sm:$0xf] %v411_v13  ;;  %v447_v21 = vld [vmem:[#allocation0 + $0x40] sm:$0xf]  ;;  %v459_v22 = vld [vmem:[#allocation0 + $0x50] sm:$0xf] }
  0x83   :  { %v471_v16 = vld [vmem:[#allocation0 + $0x60] sm:$0xf]  ;;  %v483_v17 = vld [vmem:[#allocation0 + $0x70] sm:$0xf]  ;;  %809 = vst [vmem:[%s1232_s1 + $0x10] sm:$0xf] %v423_v14 }
  0x84   :  { %817 = vst [vmem:[%s1232_s1 + $0x30] sm:$0xf] %v471_v16  ;;  %v133_v19 = vpop.permute.xlu1 %132   ;;  %v120_v20 = vpop.permute.xlu0 %119  }
  0x85   :  { %819 = vst [vmem:[%s1232_s1 + $0x38] sm:$0xf] %v483_v17  ;;  %v260_v27 = vpop.permute.xlu2 %259  }
  0x86   :  { %91 = vst.msk [vmem:[#allocation0 + $0x181] ss:$16 sm:$0xc0] %vm3_vm0, %v82_v10  }
  0x87   :  { %811 = vst [vmem:[%s1232_s1 + $0x18] sm:$0xf] %v435_v18 }
  0x88   :  { %813 = vst [vmem:[%s1232_s1 + $0x20] sm:$0xf] %v447_v21 }
  0x89   :  { %815 = vst [vmem:[%s1232_s1 + $0x28] sm:$0xf] %v459_v22 }
  0x8a   :  { %59 = vst.msk [vmem:[#allocation0 + $0x81] ss:$16 sm:$0x3] %vm3_vm0, %v56_v11  }
  0x8b   :  { %61 = vst.msk [vmem:[#allocation0 + $0x81] ss:$16 sm:$0xc] %vm3_vm0, %v56_v11  }
  0x8c   :  { %63 = vst.msk [vmem:[#allocation0 + $0x81] ss:$16 sm:$0x30] %vm3_vm0, %v56_v11   ;;  %v171_v23 = vpop.permute.xlu1 %170   ;;  %v158_v24 = vpop.permute.xlu0 %157  }
  0x8d   :  { %65 = vst.msk [vmem:[#allocation0 + $0x81] ss:$16 sm:$0xc0] %vm3_vm0, %v56_v11   ;;  %v298_v36 = vpop.permute.xlu2 %297  }
  0x8e   :  { %187 = vst.msk [vmem:[#allocation0 + $0x183] ss:$16 sm:$0x3] %vm3_vm0, %v184_v9  }
  0x8f   :  { %189 = vst.msk [vmem:[#allocation0 + $0x183] ss:$16 sm:$0xc] %vm3_vm0, %v184_v9  }
  0x90   :  { %191 = vst.msk [vmem:[#allocation0 + $0x183] ss:$16 sm:$0x30] %vm3_vm0, %v184_v9  }
  0x91   :  { %193 = vst.msk [vmem:[#allocation0 + $0x183] ss:$16 sm:$0xc0] %vm3_vm0, %v184_v9  }
  0x92   :  { %136 = vst.msk [vmem:[#allocation0 + $0x182] ss:$16 sm:$0x3] %vm3_vm0, %v133_v19  }
  0x93   :  { %138 = vst.msk [vmem:[#allocation0 + $0x182] ss:$16 sm:$0xc] %vm3_vm0, %v133_v19  }
  0x94   :  { %140 = vst.msk [vmem:[#allocation0 + $0x182] ss:$16 sm:$0x30] %vm3_vm0, %v133_v19   ;;  %v209_v34 = vpop.permute.xlu1 %208   ;;  %v1010_v35 = vpop.permute.xlu0 %195  }
  0x95   :  { %142 = vst.msk [vmem:[#allocation0 + $0x182] ss:$16 sm:$0xc0] %vm3_vm0, %v133_v19   ;;  %v337_v48 = vpop.permute.xlu2 %336  }
  0x96   :  { %123 = vst.msk [vmem:[#allocation0 + $0x102] ss:$16 sm:$0x3] %vm3_vm0, %v120_v20  }
  0x97   :  { %125 = vst.msk [vmem:[#allocation0 + $0x102] ss:$16 sm:$0xc] %vm3_vm0, %v120_v20  }
  0x98   :  { %127 = vst.msk [vmem:[#allocation0 + $0x102] ss:$16 sm:$0x30] %vm3_vm0, %v120_v20  }
  0x99   :  { %v687_v25 = vld [vmem:[#allocation0 + $0x180] sm:$0xf]  ;;  %v699_v26 = vld [vmem:[#allocation0 + $0x190] sm:$0xf] }
  0x9a   :  { %v711_v28 = vld [vmem:[#allocation0 + $0x1a0] sm:$0xf]  ;;  %853 = vst [vmem:[%s1232_s1 + $0xc0] sm:$0xf] %v687_v25  ;;  %v723_v31 = vld [vmem:[#allocation0 + $0x1b0] sm:$0xf] }
  0x9b   :  { %855 = vst [vmem:[%s1232_s1 + $0xc8] sm:$0xf] %v699_v26  ;;  %v735_v32 = vld [vmem:[#allocation0 + $0x1c0] sm:$0xf]  ;;  %v747_v33 = vld [vmem:[#allocation0 + $0x1d0] sm:$0xf] }
  0x9c   :  { %v759_v29 = vld [vmem:[#allocation0 + $0x1e0] sm:$0xf]  ;;  %v771_v30 = vld [vmem:[#allocation0 + $0x1f0] sm:$0xf]  ;;  %857 = vst [vmem:[%s1232_s1 + $0xd0] sm:$0xf] %v711_v28  ;;  %v247_v40 = vpop.permute.xlu1 %246   ;;  %v235_v44 = vpop.permute.xlu0 %234  }
  0x9d   :  { %865 = vst [vmem:[%s1232_s1 + $0xf0] sm:$0xf] %v759_v29  ;;  %v375_v58 = vpop.permute.xlu2 %374  }
  0x9e   :  { %867 = vst [vmem:[%s1232_s1 + $0xf8] sm:$0xf] %v771_v30 }
  0x9f   :  { %129 = vst.msk [vmem:[#allocation0 + $0x102] ss:$16 sm:$0xc0] %vm3_vm0, %v120_v20  }
  0xa0   :  { %859 = vst [vmem:[%s1232_s1 + $0xd8] sm:$0xf] %v723_v31 }
  0xa1   :  { %861 = vst [vmem:[%s1232_s1 + $0xe0] sm:$0xf] %v735_v32 }
  0xa2   :  { %863 = vst [vmem:[%s1232_s1 + $0xe8] sm:$0xf] %v747_v33 }
  0xa3   :  { %225 = vst.msk [vmem:[#allocation0 + $0x108] ss:$16 sm:$0x3] %vm3_vm0, %v222_v15  }
  0xa4   :  { %227 = vst.msk [vmem:[#allocation0 + $0x108] ss:$16 sm:$0xc] %vm3_vm0, %v222_v15   ;;  %v286_v51 = vpop.permute.xlu1 %285   ;;  %v273_v55 = vpop.permute.xlu0 %272  }
  0xa5   :  { %229 = vst.msk [vmem:[#allocation0 + $0x108] ss:$16 sm:$0x30] %vm3_vm0, %v222_v15  }
  0xa6   :  { %231 = vst.msk [vmem:[#allocation0 + $0x108] ss:$16 sm:$0xc0] %vm3_vm0, %v222_v15  }
  0xa7   :  { %174 = vst.msk [vmem:[#allocation0 + $0x103] ss:$16 sm:$0x3] %vm3_vm0, %v171_v23  }
  0xa8   :  { %176 = vst.msk [vmem:[#allocation0 + $0x103] ss:$16 sm:$0xc] %vm3_vm0, %v171_v23  }
  0xa9   :  { %178 = vst.msk [vmem:[#allocation0 + $0x103] ss:$16 sm:$0x30] %vm3_vm0, %v171_v23  }
  0xaa   :  { %180 = vst.msk [vmem:[#allocation0 + $0x103] ss:$16 sm:$0xc0] %vm3_vm0, %v171_v23  }
  0xab   :  { %161 = vst.msk [vmem:[#allocation0 + $0x83] ss:$16 sm:$0x3] %vm3_vm0, %v158_v24  }
  0xac   :  { %163 = vst.msk [vmem:[#allocation0 + $0x83] ss:$16 sm:$0xc] %vm3_vm0, %v158_v24   ;;  %v324_v59 = vpop.permute.xlu1 %323   ;;  %v311_v60 = vpop.permute.xlu0 %310  }
  0xad   :  { %165 = vst.msk [vmem:[#allocation0 + $0x83] ss:$16 sm:$0x30] %vm3_vm0, %v158_v24  }
  0xae   :  { %v591_v37 = vld [vmem:[#allocation0 + $0x100] sm:$0xf]  ;;  %v603_v38 = vld [vmem:[#allocation0 + $0x110] sm:$0xf] }
  0xaf   :  { %v615_v39 = vld [vmem:[#allocation0 + $0x120] sm:$0xf]  ;;  %837 = vst [vmem:[%s1232_s1 + $0x80] sm:$0xf] %v591_v37  ;;  %v627_v41 = vld [vmem:[#allocation0 + $0x130] sm:$0xf] }
  0xb0   :  { %839 = vst [vmem:[%s1232_s1 + $0x88] sm:$0xf] %v603_v38  ;;  %v639_v42 = vld [vmem:[#allocation0 + $0x140] sm:$0xf]  ;;  %v651_v43 = vld [vmem:[#allocation0 + $0x150] sm:$0xf] }
  0xb1   :  { %841 = vst [vmem:[%s1232_s1 + $0x90] sm:$0xf] %v615_v39  ;;  %v663_v45 = vld [vmem:[#allocation0 + $0x160] sm:$0xf]  ;;  %v675_v46 = vld [vmem:[#allocation0 + $0x170] sm:$0xf] }
  0xb2   :  { %167 = vst.msk [vmem:[#allocation0 + $0x83] ss:$16 sm:$0xc0] %vm3_vm0, %v158_v24   ;;  %v495_v47 = vld [vmem:[#allocation0 + $0x80] sm:$0xf] }
  0xb3   :  { %843 = vst [vmem:[%s1232_s1 + $0x98] sm:$0xf] %v627_v41  ;;  %v507_v49 = vld [vmem:[#allocation0 + $0x90] sm:$0xf]  ;;  %v519_v50 = vld [vmem:[#allocation0 + $0xa0] sm:$0xf] }
  0xb4   :  { %845 = vst [vmem:[%s1232_s1 + $0xa0] sm:$0xf] %v639_v42  ;;  %v531_v52 = vld [vmem:[#allocation0 + $0xb0] sm:$0xf]  ;;  %v543_v53 = vld [vmem:[#allocation0 + $0xc0] sm:$0xf]  ;;  %v362_v61 = vpop.permute.xlu1 %361   ;;  %v349_v62 = vpop.permute.xlu0 %348  }
  0xb5   :  { %847 = vst [vmem:[%s1232_s1 + $0xa8] sm:$0xf] %v651_v43  ;;  %v555_v54 = vld [vmem:[#allocation0 + $0xd0] sm:$0xf] }
  0xb6   :  { %849 = vst [vmem:[%s1232_s1 + $0xb0] sm:$0xf] %v663_v45 }
  0xb7   :  { %851 = vst [vmem:[%s1232_s1 + $0xb8] sm:$0xf] %v675_v46 }
  0xb8   :  { %821 = vst [vmem:[%s1232_s1 + $0x40] sm:$0xf] %v495_v47 }
  0xb9   :  { %263 = vst.msk [vmem:[#allocation0 + $0x89] ss:$16 sm:$0x3] %vm3_vm0, %v260_v27   ;;  %v567_v56 = vld [vmem:[#allocation0 + $0xe0] sm:$0xf] }
  0xba   :  { %265 = vst.msk [vmem:[#allocation0 + $0x89] ss:$16 sm:$0xc] %vm3_vm0, %v260_v27   ;;  %v579_v57 = vld [vmem:[#allocation0 + $0xf0] sm:$0xf] }
  0xbb   :  { %267 = vst.msk [vmem:[#allocation0 + $0x89] ss:$16 sm:$0x30] %vm3_vm0, %v260_v27  }
  0xbc   :  { %269 = vst.msk [vmem:[#allocation0 + $0x89] ss:$16 sm:$0xc0] %vm3_vm0, %v260_v27   ;;  %v388_v2 = vpop.permute.xlu0 %387  }
  0xbd   :  { %823 = vst [vmem:[%s1232_s1 + $0x48] sm:$0xf] %v507_v49 }
  0xbe   :  { %825 = vst [vmem:[%s1232_s1 + $0x50] sm:$0xf] %v519_v50 }
  0xbf   :  { %827 = vst [vmem:[%s1232_s1 + $0x58] sm:$0xf] %v531_v52 }
  0xc0   :  { %829 = vst [vmem:[%s1232_s1 + $0x60] sm:$0xf] %v543_v53 }
  0xc1   :  { %831 = vst [vmem:[%s1232_s1 + $0x68] sm:$0xf] %v555_v54 }
  0xc2   :  { %833 = vst [vmem:[%s1232_s1 + $0x70] sm:$0xf] %v567_v56 }
  0xc3   :  { %835 = vst [vmem:[%s1232_s1 + $0x78] sm:$0xf] %v579_v57 }
  0xc4   :  { %212 = vst.msk [vmem:[#allocation0 + $0x88] ss:$16 sm:$0x3] %vm3_vm0, %v209_v34  }
  0xc5   :  { %214 = vst.msk [vmem:[#allocation0 + $0x88] ss:$16 sm:$0xc] %vm3_vm0, %v209_v34  }
  0xc6   :  { %216 = vst.msk [vmem:[#allocation0 + $0x88] ss:$16 sm:$0x30] %vm3_vm0, %v209_v34  }
  0xc7   :  { %218 = vst.msk [vmem:[#allocation0 + $0x88] ss:$16 sm:$0xc0] %vm3_vm0, %v209_v34  }
  0xc8   :  { %199 = vst.msk [vmem:[#allocation0 + $0x8] ss:$16 sm:$0x3] %vm3_vm0, %v1010_v35  }
  0xc9   :  { %201 = vst.msk [vmem:[#allocation0 + $0x8] ss:$16 sm:$0xc] %vm3_vm0, %v1010_v35  }
  0xca   :  { %203 = vst.msk [vmem:[#allocation0 + $0x8] ss:$16 sm:$0x30] %vm3_vm0, %v1010_v35  }
  0xcb   :  { %205 = vst.msk [vmem:[#allocation0 + $0x8] ss:$16 sm:$0xc0] %vm3_vm0, %v1010_v35  }
  0xcc   :  { %301 = vst.msk [vmem:[#allocation0 + $0xa] ss:$16 sm:$0x3] %vm3_vm0, %v298_v36  }
  0xcd   :  { %303 = vst.msk [vmem:[#allocation0 + $0xa] ss:$16 sm:$0xc] %vm3_vm0, %v298_v36  }
  0xce   :  { %305 = vst.msk [vmem:[#allocation0 + $0xa] ss:$16 sm:$0x30] %vm3_vm0, %v298_v36  }
  0xcf   :  { %307 = vst.msk [vmem:[#allocation0 + $0xa] ss:$16 sm:$0xc0] %vm3_vm0, %v298_v36  }
  0xd0   :  { %250 = vst.msk [vmem:[#allocation0 + $0x9] ss:$16 sm:$0x3] %vm3_vm0, %v247_v40  }
  0xd1   :  { %252 = vst.msk [vmem:[#allocation0 + $0x9] ss:$16 sm:$0xc] %vm3_vm0, %v247_v40  }
  0xd2   :  { %254 = vst.msk [vmem:[#allocation0 + $0x9] ss:$16 sm:$0x30] %vm3_vm0, %v247_v40  }
  0xd3   :  { %256 = vst.msk [vmem:[#allocation0 + $0x9] ss:$16 sm:$0xc0] %vm3_vm0, %v247_v40  }
  0xd4   :  { %238 = vst.msk [vmem:[#allocation0 + $0x188] ss:$16 sm:$0x3] %vm3_vm0, %v235_v44  }
  0xd5   :  { %240 = vst.msk [vmem:[#allocation0 + $0x188] ss:$16 sm:$0xc] %vm3_vm0, %v235_v44  }
  0xd6   :  { %242 = vst.msk [vmem:[#allocation0 + $0x188] ss:$16 sm:$0x30] %vm3_vm0, %v235_v44  }
  0xd7   :  { %244 = vst.msk [vmem:[#allocation0 + $0x188] ss:$16 sm:$0xc0] %vm3_vm0, %v235_v44  }
  0xd8   :  { %340 = vst.msk [vmem:[#allocation0 + $0x18a] ss:$16 sm:$0x3] %vm3_vm0, %v337_v48  }
  0xd9   :  { %342 = vst.msk [vmem:[#allocation0 + $0x18a] ss:$16 sm:$0xc] %vm3_vm0, %v337_v48  }
  0xda   :  { %344 = vst.msk [vmem:[#allocation0 + $0x18a] ss:$16 sm:$0x30] %vm3_vm0, %v337_v48  }
  0xdb   :  { %346 = vst.msk [vmem:[#allocation0 + $0x18a] ss:$16 sm:$0xc0] %vm3_vm0, %v337_v48  }
  0xdc   :  { %289 = vst.msk [vmem:[#allocation0 + $0x189] ss:$16 sm:$0x3] %vm3_vm0, %v286_v51  }
  0xdd   :  { %291 = vst.msk [vmem:[#allocation0 + $0x189] ss:$16 sm:$0xc] %vm3_vm0, %v286_v51  }
  0xde   :  { %293 = vst.msk [vmem:[#allocation0 + $0x189] ss:$16 sm:$0x30] %vm3_vm0, %v286_v51  }
  0xdf   :  { %295 = vst.msk [vmem:[#allocation0 + $0x189] ss:$16 sm:$0xc0] %vm3_vm0, %v286_v51  }
  0xe0   :  { %276 = vst.msk [vmem:[#allocation0 + $0x109] ss:$16 sm:$0x3] %vm3_vm0, %v273_v55  }
  0xe1   :  { %278 = vst.msk [vmem:[#allocation0 + $0x109] ss:$16 sm:$0xc] %vm3_vm0, %v273_v55  }
  0xe2   :  { %280 = vst.msk [vmem:[#allocation0 + $0x109] ss:$16 sm:$0x30] %vm3_vm0, %v273_v55  }
  0xe3   :  { %282 = vst.msk [vmem:[#allocation0 + $0x109] ss:$16 sm:$0xc0] %vm3_vm0, %v273_v55  }
  0xe4   :  { %378 = vst.msk [vmem:[#allocation0 + $0x10b] ss:$16 sm:$0x3] %vm3_vm0, %v375_v58  }
  0xe5   :  { %380 = vst.msk [vmem:[#allocation0 + $0x10b] ss:$16 sm:$0xc] %vm3_vm0, %v375_v58  }
  0xe6   :  { %382 = vst.msk [vmem:[#allocation0 + $0x10b] ss:$16 sm:$0x30] %vm3_vm0, %v375_v58  }
  0xe7   :  { %384 = vst.msk [vmem:[#allocation0 + $0x10b] ss:$16 sm:$0xc0] %vm3_vm0, %v375_v58  }
  0xe8   :  { %327 = vst.msk [vmem:[#allocation0 + $0x10a] ss:$16 sm:$0x3] %vm3_vm0, %v324_v59  }
  0xe9   :  { %329 = vst.msk [vmem:[#allocation0 + $0x10a] ss:$16 sm:$0xc] %vm3_vm0, %v324_v59  }
  0xea   :  { %331 = vst.msk [vmem:[#allocation0 + $0x10a] ss:$16 sm:$0x30] %vm3_vm0, %v324_v59  }
  0xeb   :  { %333 = vst.msk [vmem:[#allocation0 + $0x10a] ss:$16 sm:$0xc0] %vm3_vm0, %v324_v59  }
  0xec   :  { %314 = vst.msk [vmem:[#allocation0 + $0x8a] ss:$16 sm:$0x3] %vm3_vm0, %v311_v60  }
  0xed   :  { %316 = vst.msk [vmem:[#allocation0 + $0x8a] ss:$16 sm:$0xc] %vm3_vm0, %v311_v60  }
  0xee   :  { %318 = vst.msk [vmem:[#allocation0 + $0x8a] ss:$16 sm:$0x30] %vm3_vm0, %v311_v60  }
  0xef   :  { %v597_v63 = vld [vmem:[#allocation0 + $0x108] sm:$0xf]  ;;  %v609_v0 = vld [vmem:[#allocation0 + $0x118] sm:$0xf] }
  0xf0   :  { %v621_v1 = vld [vmem:[#allocation0 + $0x128] sm:$0xf]  ;;  %838 = vst [vmem:[%s1232_s1 + $0x84] sm:$0xf] %v597_v63  ;;  %v633_v3 = vld [vmem:[#allocation0 + $0x138] sm:$0xf] }
  0xf1   :  { %840 = vst [vmem:[%s1232_s1 + $0x8c] sm:$0xf] %v609_v0  ;;  %v645_v4 = vld [vmem:[#allocation0 + $0x148] sm:$0xf]  ;;  %v657_v5 = vld [vmem:[#allocation0 + $0x158] sm:$0xf] }
  0xf2   :  { %842 = vst [vmem:[%s1232_s1 + $0x94] sm:$0xf] %v621_v1  ;;  %v669_v6 = vld [vmem:[#allocation0 + $0x168] sm:$0xf]  ;;  %v681_v7 = vld [vmem:[#allocation0 + $0x178] sm:$0xf] }
  0xf3   :  { %320 = vst.msk [vmem:[#allocation0 + $0x8a] ss:$16 sm:$0xc0] %vm3_vm0, %v311_v60  }
  0xf4   :  { %844 = vst [vmem:[%s1232_s1 + $0x9c] sm:$0xf] %v633_v3 }
  0xf5   :  { %846 = vst [vmem:[%s1232_s1 + $0xa4] sm:$0xf] %v645_v4 }
  0xf6   :  { %848 = vst [vmem:[%s1232_s1 + $0xac] sm:$0xf] %v657_v5 }
  0xf7   :  { %850 = vst [vmem:[%s1232_s1 + $0xb4] sm:$0xf] %v669_v6 }
  0xf8   :  { %852 = vst [vmem:[%s1232_s1 + $0xbc] sm:$0xf] %v681_v7 }
  0xf9   :  { %365 = vst.msk [vmem:[#allocation0 + $0x8b] ss:$16 sm:$0x3] %vm3_vm0, %v362_v61  }
  0xfa   :  { %367 = vst.msk [vmem:[#allocation0 + $0x8b] ss:$16 sm:$0xc] %vm3_vm0, %v362_v61  }
  0xfb   :  { %369 = vst.msk [vmem:[#allocation0 + $0x8b] ss:$16 sm:$0x30] %vm3_vm0, %v362_v61  }
  0xfc   :  { %371 = vst.msk [vmem:[#allocation0 + $0x8b] ss:$16 sm:$0xc0] %vm3_vm0, %v362_v61  }
  0xfd   :  { %352 = vst.msk [vmem:[#allocation0 + $0xb] ss:$16 sm:$0x3] %vm3_vm0, %v349_v62  }
  0xfe   :  { %354 = vst.msk [vmem:[#allocation0 + $0xb] ss:$16 sm:$0xc] %vm3_vm0, %v349_v62  }
  0xff   :  { %356 = vst.msk [vmem:[#allocation0 + $0xb] ss:$16 sm:$0x30] %vm3_vm0, %v349_v62  }
 0x100   :  { %v501_v8 = vld [vmem:[#allocation0 + $0x88] sm:$0xf]  ;;  %v513_v9 = vld [vmem:[#allocation0 + $0x98] sm:$0xf] }
 0x101   :  { %822 = vst [vmem:[%s1232_s1 + $0x44] sm:$0xf] %v501_v8  ;;  %v525_v10 = vld [vmem:[#allocation0 + $0xa8] sm:$0xf]  ;;  %v537_v11 = vld [vmem:[#allocation0 + $0xb8] sm:$0xf] }
 0x102   :  { %824 = vst [vmem:[%s1232_s1 + $0x4c] sm:$0xf] %v513_v9  ;;  %v549_v12 = vld [vmem:[#allocation0 + $0xc8] sm:$0xf]  ;;  %v561_v13 = vld [vmem:[#allocation0 + $0xd8] sm:$0xf] }
 0x103   :  { %826 = vst [vmem:[%s1232_s1 + $0x54] sm:$0xf] %v525_v10  ;;  %v573_v14 = vld [vmem:[#allocation0 + $0xe8] sm:$0xf]  ;;  %v585_v15 = vld [vmem:[#allocation0 + $0xf8] sm:$0xf] }
 0x104   :  { %828 = vst [vmem:[%s1232_s1 + $0x5c] sm:$0xf] %v537_v11  ;;  %v405_v16 = vld [vmem:[#allocation0 + $0x8] sm:$0xf]  ;;  %v417_v17 = vld [vmem:[#allocation0 + $0x18] sm:$0xf] }
 0x105   :  { %830 = vst [vmem:[%s1232_s1 + $0x64] sm:$0xf] %v549_v12  ;;  %v429_v18 = vld [vmem:[#allocation0 + $0x28] sm:$0xf]  ;;  %v441_v19 = vld [vmem:[#allocation0 + $0x38] sm:$0xf] }
 0x106   :  { %832 = vst [vmem:[%s1232_s1 + $0x6c] sm:$0xf] %v561_v13  ;;  %v453_v20 = vld [vmem:[#allocation0 + $0x48] sm:$0xf]  ;;  %v465_v21 = vld [vmem:[#allocation0 + $0x58] sm:$0xf] }
 0x107   :  { %834 = vst [vmem:[%s1232_s1 + $0x74] sm:$0xf] %v573_v14 }
 0x108   :  { %836 = vst [vmem:[%s1232_s1 + $0x7c] sm:$0xf] %v585_v15 }
 0x109   :  { %358 = vst.msk [vmem:[#allocation0 + $0xb] ss:$16 sm:$0xc0] %vm3_vm0, %v349_v62  }
 0x10a   :  { %806 = vst [vmem:[%s1232_s1 + $0x4] sm:$0xf] %v405_v16 }
 0x10b   :  { %808 = vst [vmem:[%s1232_s1 + $0xc] sm:$0xf] %v417_v17 }
 0x10c   :  { %810 = vst [vmem:[%s1232_s1 + $0x14] sm:$0xf] %v429_v18 }
 0x10d   :  { %812 = vst [vmem:[%s1232_s1 + $0x1c] sm:$0xf] %v441_v19 }
 0x10e   :  { %814 = vst [vmem:[%s1232_s1 + $0x24] sm:$0xf] %v453_v20 }
 0x10f   :  { %816 = vst [vmem:[%s1232_s1 + $0x2c] sm:$0xf] %v465_v21 }
 0x110   :  { %391 = vst.msk [vmem:[#allocation0 + $0x18b] ss:$16 sm:$0x3] %vm3_vm0, %v388_v2   ;;  %v477_v22 = vld [vmem:[#allocation0 + $0x68] sm:$0xf] }
 0x111   :  { %393 = vst.msk [vmem:[#allocation0 + $0x18b] ss:$16 sm:$0xc] %vm3_vm0, %v388_v2   ;;  %v489_v23 = vld [vmem:[#allocation0 + $0x78] sm:$0xf] }
 0x112   :  { %395 = vst.msk [vmem:[#allocation0 + $0x18b] ss:$16 sm:$0x30] %vm3_vm0, %v388_v2  }
 0x113   :  { %397 = vst.msk [vmem:[#allocation0 + $0x18b] ss:$16 sm:$0xc0] %vm3_vm0, %v388_v2  }
 0x114   :  { %818 = vst [vmem:[%s1232_s1 + $0x34] sm:$0xf] %v477_v22 }
 0x115   :  { %820 = vst [vmem:[%s1232_s1 + $0x3c] sm:$0xf] %v489_v23 }
 0x117   :  { %v693_v24 = vld [vmem:[#allocation0 + $0x188] sm:$0xf]  ;;  %v705_v25 = vld [vmem:[#allocation0 + $0x198] sm:$0xf] }
 0x118   :  { %854 = vst [vmem:[%s1232_s1 + $0xc4] sm:$0xf] %v693_v24  ;;  %v717_v26 = vld [vmem:[#allocation0 + $0x1a8] sm:$0xf]  ;;  %v729_v27 = vld [vmem:[#allocation0 + $0x1b8] sm:$0xf] }
 0x119   :  { %856 = vst [vmem:[%s1232_s1 + $0xcc] sm:$0xf] %v705_v25  ;;  %v741_v28 = vld [vmem:[#allocation0 + $0x1c8] sm:$0xf]  ;;  %v753_v29 = vld [vmem:[#allocation0 + $0x1d8] sm:$0xf] }
 0x11a   :  { %858 = vst [vmem:[%s1232_s1 + $0xd4] sm:$0xf] %v717_v26  ;;  %v765_v30 = vld [vmem:[#allocation0 + $0x1e8] sm:$0xf]  ;;  %v777_v31 = vld [vmem:[#allocation0 + $0x1f8] sm:$0xf] }
 0x11b   :  { %860 = vst [vmem:[%s1232_s1 + $0xdc] sm:$0xf] %v729_v27 }
 0x11c   :  { %862 = vst [vmem:[%s1232_s1 + $0xe4] sm:$0xf] %v741_v28 }
 0x11d   :  { %864 = vst [vmem:[%s1232_s1 + $0xec] sm:$0xf] %v753_v29 }
 0x11e   :  { %866 = vst [vmem:[%s1232_s1 + $0xf4] sm:$0xf] %v765_v30 }
 0x11f   :  { %868 = vst [vmem:[%s1232_s1 + $0xfc] sm:$0xf] %v777_v31 }

// kernel: smha_forward.3
= control target key start
LH: loop header
LB: loop body
LE: loop exit
PB: predicated region body
PF: predicated region fallthrough
CT: control target
= control target key end

     0   :  { %s547_s12 = smov 0   ;;  %s549_s13 = smov 0   ;;  %s616_s0 = inlined_call_operand.vmem [shape: f32[3,64,32], index: 0, kind: input, shape index: {}]   ;;  %s617_s1 = inlined_call_operand.vmem [shape: f32[3,32,32], index: 1, kind: input, shape index: {}]   ;;  %s618_s2 = inlined_call_operand.vmem [shape: f32[3,1,32], index: 2, kind: input, shape index: {}]   ;;  %s619_s3 = inlined_call_operand.vmem [shape: f32[3,64,32], index: 3, kind: output, shape index: {}]  }
   0x1   :  { %s551_s14 = smov 0  }
   0x2 LB: > { %s25_s15 = sadd.s32 1, %s521_s13  ;;  %p446_p0 = scmp.ge.s32.totalorder %s525_s14, 1  ;;  %s525_s14 = sphi %s551_s14, %s13_s14   ;;  %s521_s13 = sphi %s549_s13, %s621_s13   ;;  %s517_s12 = sphi %s547_s12, %s620_s12  }
   0x3   : > { %p27_p1 = scmp.ge.s32.totalorder %s25_s15, 3  ;;  %p176_p2 = scmp.lt.s32.totalorder %s525_s14, 4 }
   0x5   : > { %s623_s15 = smov (%p27_p1, %s25_s15), 0  ;;  %p177_p3 = pnand %p446_p0, %p176_p2 }
   0x6   : > { %p217_p4 = scmp.lt.s32.totalorder (!%p177_p3), %s517_s12, 2 }
   0x7   : > { %180 = sbr.rel (%p177_p3) target bundleno = 167 (0xa7), region = 32 }
   0xc   : > { %s625_s12 = smov (!%p217_p4, %s517_s12), 2  ;;  %vm260_vm0 = vcmask 261120  }
   0xd   : > { %s463_s16 = sshll.u32 %s625_s12, 6  ;;  %s464_s17 = sshll.u32 %s625_s12, 5 }
   0xe   : > { %s230_s20 = scalar_lea.vmem %s617_s1, %s464_s17  ;;  %s233_s23 = scalar_lea.vmem %s618_s2, %s625_s12 }
   0xf   : > { %v255_v0 = vld [vmem:[%s230_s20 + $0x18] sm:$0xff]  ;;  %v254_v1 = vld [vmem:[%s230_s20 + $0x10] sm:$0xff]  ;;  %v253_v2 = vld [vmem:[%s230_s20 + $0x8] sm:$0xff]  ;;  %s224_s26 = scalar_lea.vmem %s616_s0, %s463_s16  ;;  %s242_s4 = scalar_lea.vmem %s619_s3, %s463_s16 }
  0x10   : > { %467 = vmatpush.msra.mxu2 %v255_v0  ;;  %468 = vmatpush.msra.mxu3 %v255_v0  ;;  %v252_v3 = vld [vmem:[%s230_s20] sm:$0xff]  ;;  %v250_v5 = vld [vmem:[%s224_s26 + $0x30] sm:$0xff]  ;;  %v249_v8 = vld [vmem:[%s224_s26 + $0x28] sm:$0xff] }
  0x11   : > { %297 = vmatpush.msra.mxu0 %v255_v0  ;;  %466 = vmatpush.msra.mxu1 %v255_v0  ;;  %v248_v4 = vld [vmem:[%s224_s26 + $0x20] sm:$0xff]  ;;  %v246_v7 = vld [vmem:[%s224_s26 + $0x10] sm:$0xff]  ;;  %v251_v9 = vld [vmem:[%s224_s26 + $0x38] sm:$0xff] }
  0x12   : > { %470 = vmatpush.msra.mxu2 %v254_v1  ;;  %471 = vmatpush.msra.mxu3 %v254_v1  ;;  %v244_v6 = vld [vmem:[%s224_s26] sm:$0xff]  ;;  %v245_v10 = vld [vmem:[%s224_s26 + $0x8] sm:$0xff]  ;;  %v247_v11 = vld [vmem:[%s224_s26 + $0x18] sm:$0xff] }
  0x13   : > { %298 = vmatpush.msra.mxu0 %v254_v1  ;;  %469 = vmatpush.msra.mxu1 %v254_v1  ;;  %v502_v12 = vld [vmem:[%s233_s23] ss:$0 sm:$0xff] }
  0x14   : > { %473 = vmatpush.msra.mxu2 %v253_v2  ;;  %474 = vmatpush.msra.mxu3 %v253_v2 }
  0x15   : > { %299 = vmatpush.msra.mxu0 %v253_v2  ;;  %472 = vmatpush.msra.mxu1 %v253_v2 }
  0x16   : > { %476 = vmatpush.msra.mxu2 %v252_v3  ;;  %477 = vmatpush.msra.mxu3 %v252_v3 }
  0x17   : > { %457 = vmatmul.msk.f32.vlgmr.msra.gmra.mxu2 %vm260_vm0, %v248_v4  ;;  %459 = vmatmul.msk.f32.vlgmr.msra.gmra.mxu3 %vm260_vm0, %v250_v5 }
  0x18   : > { %300 = vmatpush.msra.mxu0 %v252_v3  ;;  %475 = vmatpush.msra.mxu1 %v252_v3 }
  0x19   : > { %453 = vmatmul.msk.f32.vlgmr.msra.gmra.mxu0 %vm260_vm0, %v244_v6  ;;  %455 = vmatmul.msk.f32.vlgmr.msra.gmra.mxu1 %vm260_vm0, %v246_v7 }
  0x1f   : > { %458 = vmatmul.msk.f32.gmra.mxu2 %vm260_vm0, %v249_v8  ;;  %460 = vmatmul.msk.f32.gmra.mxu3 %vm260_vm0, %v251_v9 }
  0x21   : > { %454 = vmatmul.msk.f32.gmra.mxu0 %vm260_vm0, %v245_v10  ;;  %456 = vmatmul.msk.f32.gmra.mxu1 %vm260_vm0, %v247_v11 }
  0x96   : > { %v302_v13 = vpop.f32.mrf.mxu0  ;;  %v308_v14 = vpop.f32.mrf.mxu1 }
  0x97   : > { %v303_v15 = vadd.f32 %v502_v12, %v302_v13  ;;  %v309_v16 = vadd.f32 %v502_v12, %v308_v14 }
  0x99   : > { %326 = vst.msk [vmem:[%s242_s4] sm:$0xff] %vm260_vm0, %v303_v15 }
  0x9a   : > { %328 = vst.msk [vmem:[%s242_s4 + $0x10] sm:$0xff] %vm260_vm0, %v309_v16  ;;  %v314_v17 = vpop.f32.mrf.mxu2  ;;  %v320_v18 = vpop.f32.mrf.mxu3 }
  0x9b   : > { %v315_v19 = vadd.f32 %v502_v12, %v314_v17  ;;  %v321_v20 = vadd.f32 %v502_v12, %v320_v18 }
  0x9d   : > { %330 = vst.msk [vmem:[%s242_s4 + $0x20] sm:$0xff] %vm260_vm0, %v315_v19 }
  0x9e   : > { %332 = vst.msk [vmem:[%s242_s4 + $0x30] sm:$0xff] %vm260_vm0, %v321_v20  ;;  %v305_v21 = vpop.f32.mrf.mxu0  ;;  %v311_v22 = vpop.f32.mrf.mxu1 }
  0x9f   : > { %v306_v23 = vadd.f32 %v502_v12, %v305_v21  ;;  %v312_v24 = vadd.f32 %v502_v12, %v311_v22 }
  0xa1   : > { %327 = vst.msk [vmem:[%s242_s4 + $0x8] sm:$0xff] %vm260_vm0, %v306_v23 }
  0xa2   : > { %329 = vst.msk [vmem:[%s242_s4 + $0x18] sm:$0xff] %vm260_vm0, %v312_v24  ;;  %v317_v25 = vpop.f32.mrf.mxu2  ;;  %v323_v26 = vpop.f32.mrf.mxu3 }
  0xa3   : > { %v318_v27 = vadd.f32 %v502_v12, %v317_v25  ;;  %v324_v28 = vadd.f32 %v502_v12, %v323_v26 }
  0xa5   : > { %331 = vst.msk [vmem:[%s242_s4 + $0x28] sm:$0xff] %vm260_vm0, %v318_v27 }
  0xa6   : > { %333 = vst.msk [vmem:[%s242_s4 + $0x38] sm:$0xff] %vm260_vm0, %v324_v28 }
  0xa7 PF: > { %s13_s14 = sadd.s32 1, %s525_s14   ;;  %s620_s12 = smov %s521_s13 }
  0xa8   : > { %p10_p5 = scmp.ge.s32.totalorder %s13_s14, 5   ;;  %s621_s13 = smov %s623_s15 }
  0xaa   :  { %12 = sbr.rel (!%p10_p5) target bundleno = 2 (0x2), region = 68 }

// kernel: smha_forward.5
= control target key start
LH: loop header
LB: loop body
LE: loop exit
PB: predicated region body
PF: predicated region fallthrough
CT: control target
= control target key end

     0   :  { %8 = vsyncpa [#allocation3], 0  ;;  %s727_s0 = inlined_call_operand.vmem [shape: f32[1,64,32], index: 0, kind: input, shape index: {}]   ;;  %s728_s1 = inlined_call_operand.vmem [shape: f32[1,32,32], index: 1, kind: input, shape index: {}]   ;;  %s729_s2 = inlined_call_operand.vmem [shape: f32[1,1,32], index: 2, kind: input, shape index: {}]   ;;  %s730_s3 = inlined_call_operand.hbm [shape: f32[1,64,32], index: 3, kind: output, shape index: {}]  }
   0x1   :  { %10 = vsyncpa [#allocation3 + $0x1], 0  ;;  %s608_s12 = smov 0   ;;  %s610_s13 = smov 0  }
   0x2   :  { %s612_s14 = smov 0   ;;  %s614_s15 = smov 0  }
   0x3   :  { %s616_s16 = smov 0   ;;  %s618_s17 = smov 0  }
   0x4 LB: > { %s416_s18 = sadd.s32 4294967295, %s584_s17   ;;  %s417_s19 = sadd.s32 4294967294, %s584_s17   ;;  %s584_s17 = sphi %s618_s17, %s16_s17   ;;  %s580_s16 = sphi %s616_s16, %s737_s16   ;;  %s576_s15 = sphi %s614_s15, %s736_s15   ;;  %s572_s14 = sphi %s612_s14, %s735_s14   ;;  %s568_s13 = sphi %s610_s13, %s734_s13   ;;  %s564_s12 = sphi %s608_s12, %s733_s12  }
   0x5   : > { %s25_s20 = sadd.s32 1, %s580_s16  ;;  %s117_s21 = sadd.s32 1, %s572_s14 }
   0x6   : > { %p26_p0 = scmp.ge.s32.totalorder %s25_s20, 2  ;;  %p127_p1 = scmp.ne.s32.totalorder %s572_s14, %s568_s13 }
   0x7   : > { %p128_p2 = scmp.eq.s32.totalorder %s416_s18, 1  ;;  %p133_p3 = scmp.ne.s32.totalorder %s568_s13, %s564_s12 }
   0x8   : > { %s739_s20 = smov (%p26_p0, %s25_s20), 0  ;;  %p134_p5 = scmp.eq.s32.totalorder %s417_s19, 1 }
   0x9   : > { %p648_p4 = por %p128_p2, %p127_p1  ;;  %s113_s23 = ssub.s32 %s580_s16, %s739_s20 }
   0xa   : > { %p422_p6 = scmp.ge.s32.totalorder %s584_s17, 1  ;;  %p115_p7 = scmp.eq.s32.totalorder %s113_s23, 0 }
   0xb   : > { %p655_p8 = por %p134_p5, %p133_p3  ;;  %p179_p9 = scmp.lt.s32.totalorder %s584_s17, 3 }
   0xc   : > { %s661_s25 = scalar_select %p115_p7, %s572_s14, %s117_s21  }
   0xd   : > { %p180_p10 = pnand %p422_p6, %p179_p9 }
   0xe   : > { %s424_s30 = sshll.u32 (!%p180_p10), %s576_s15, 2  ;;  %s212_s18 = sand.u32 (!%p180_p10), 1, %s568_s13  }
   0xf   : > { %183 = sbr.rel (%p180_p10) target bundleno = 167 (0xa7), region = 32  ;;  %p218_p11 = scmp.lt.s32.totalorder (!%p180_p10), %s424_s30, 7 }
  0x10   : > { %s423_s19 = sshll.u32 (!%p180_p10), %s212_s18, 5  ;;  %s435_s21 = sshll.u32 (!%p180_p10), %s576_s15, 5 }
  0x11   : > { %s306_s29 = scalar_lea.hbm (!%p180_p10), %s730_s3, %s435_s21  ;;  %s293_s15 = scalar_lea.sflag (!%p180_p10), [#allocation3], %s212_s18 }
  0x12   : > { %s309_s5 = sshll.u32 (!%p180_p10), %s306_s29, 4  ;;  %s526_s10 = scalar_lea.hbm (!%p180_p10), %s730_s3, 64  ;;  %s310_s5 = int_to_ptr.hbm [resolvable:$true] %s309_s5 }
  0x13   : > { %s520_s6 = sshra.s32 (!%p180_p10), %s310_s5, 4  ;;  %s521_s6 = int_to_ptr.hbm [resolvable:$true] %s520_s6 }
  0x14   : > { %v241_v0 = vld [vmem:[%s728_s1 + $0x18] sm:$0xff]  ;;  %v240_v1 = vld [vmem:[%s728_s1 + $0x10] sm:$0xff]  ;;  %v239_v2 = vld [vmem:[%s728_s1 + $0x8] sm:$0xff]  ;;  %s741_s30 = smov (!%p218_p11, %s424_s30), 7  ;;  %vm246_vm0 = vcmask 261120   ;;  %s522_s7 = scalar_lea.hbm %s521_s6, 32 }
  0x15   : > { %437 = vmatpush.msra.mxu2 %v241_v0  ;;  %438 = vmatpush.msra.mxu3 %v241_v0  ;;  %v238_v3 = vld [vmem:[%s728_s1] sm:$0xff]  ;;  %s425_s8 = sshll.u32 %s741_s30, 3  ;;  %s214_s30 = scalar_lea.vmem [#allocation2], %s423_s19 }
  0x16   : > { %271 = vmatpush.msra.mxu0 %v241_v0  ;;  %436 = vmatpush.msra.mxu1 %v241_v0  ;;  %s223_s11 = scalar_lea.vmem %s727_s0, %s425_s8  ;;  %v505_v8 = vld [vmem:[%s729_s2] ss:$0 sm:$0xff]  ;;  %s307_s4 = sshll.u32 %s214_s30, 4  ;;  %s308_s4 = int_to_ptr.vmem [resolvable:$true] %s307_s4 }
  0x17   : > { %440 = vmatpush.msra.mxu2 %v240_v1  ;;  %441 = vmatpush.msra.mxu3 %v240_v1  ;;  %v236_v4 = vld [vmem:[%s223_s11 + $0x10] sm:$0xff]  ;;  %v237_v5 = vld [vmem:[%s223_s11 + $0x18] sm:$0xff]  ;;  %v234_v6 = vld [vmem:[%s223_s11] sm:$0xff]  ;;  %p523_p12 = scmp.ne.s32.totalorder %s521_s6, %s522_s7  ;;  %p527_p1 = scmp.lt.s32.totalorder %s521_s6, %s730_s3 }
  0x18   : > { %272 = vmatpush.msra.mxu0 %v240_v1  ;;  %439 = vmatpush.msra.mxu1 %v240_v1  ;;  %v235_v7 = vld [vmem:[%s223_s11 + $0x8] sm:$0xff]  ;;  %p528_p2 = scmp.lt.s32.totalorder %s526_s10, %s522_s7 }
  0x19   : > { %443 = vmatpush.msra.mxu2 %v239_v2  ;;  %444 = vmatpush.msra.mxu3 %v239_v2  ;;  %p524_p13 = pnand %p523_p12, %p648_p4 }
  0x1a   : > { %273 = vmatpush.msra.mxu0 %v239_v2  ;;  %442 = vmatpush.msra.mxu1 %v239_v2  ;;  %p529_p3 = por %p528_p2, %p527_p1 }
  0x1b   : > { %446 = vmatpush.msra.mxu2 %v238_v3  ;;  %447 = vmatpush.msra.mxu3 %v238_v3  ;;  %p525_p0 = pneg %p524_p13 }
  0x1c   : > { %428 = vmatmul.msk.f32.vlgmr.msra.gmra.mxu2 %vm246_vm0, %v236_v4  ;;  %429 = vmatmul.msk.f32.vlgmr.msra.gmra.mxu3 %vm246_vm0, %v237_v5 }
  0x1d   : > { %274 = vmatpush.msra.mxu0 %v238_v3  ;;  %445 = vmatpush.msra.mxu1 %v238_v3  ;;  %p530_p5 = pnand %p529_p3, %p525_p0 }
  0x1e   : > { %426 = vmatmul.msk.f32.vlgmr.msra.gmra.mxu0 %vm246_vm0, %v234_v6  ;;  %427 = vmatmul.msk.f32.vlgmr.msra.gmra.mxu1 %vm246_vm0, %v235_v7 }
  0x9b   : > { %v276_v9 = vpop.f32.mrf.mxu0  ;;  %v279_v10 = vpop.f32.mrf.mxu1 }
  0x9c   : > { %v277_v11 = vadd.f32 %v505_v8, %v276_v9  ;;  %v280_v12 = vadd.f32 %v505_v8, %v279_v10 }
  0x9e   : > { %288 = vst.msk [vmem:[%s214_s30] sm:$0xff] %vm246_vm0, %v277_v11 }
  0x9f   : > { %289 = vst.msk [vmem:[%s214_s30 + $0x8] sm:$0xff] %vm246_vm0, %v280_v12  ;;  %v282_v13 = vpop.f32.mrf.mxu2  ;;  %v285_v14 = vpop.f32.mrf.mxu3 }
  0xa0   : > { %v283_v15 = vadd.f32 %v505_v8, %v282_v13  ;;  %v286_v16 = vadd.f32 %v505_v8, %v285_v14 }
  0xa2   : > { %290 = vst.msk [vmem:[%s214_s30 + $0x10] sm:$0xff] %vm246_vm0, %v283_v15 }
  0xa3   : > { %291 = vst.msk [vmem:[%s214_s30 + $0x18] sm:$0xff] %vm246_vm0, %v286_v16 }
  0xa4   : > { %533 = shalt.err (!%p530_p5)
}
  0xa5   : > { %s586_s18 = smov 128   ;;  %s587_s21 = smov 8  }
  0xa6   : > { %448 = dma.vmem_to_hbm [thread:$0]  (%p648_p4), %s308_s4, 512, %s310_s5, %s293_s15, %s586_s18, %s586_s18, %s587_s21  }
  0xa7 PF: > { %p454_p6 = scmp.ge.s32.totalorder %s584_s17, 2  ;;  %s324_s23 = sand.u32 1, %s564_s12  }
  0xa8   : > { %s325_s26 = scalar_lea.sflag [#allocation3], %s324_s23 }
  0xa9   : > { %p451_p7 = pnand %p454_p6, %p655_p8 }
  0xab   : > { %p452_p9 = pneg %p451_p7 }
  0xad   : > { %559 = dma.done.wait (%p452_p9), %s325_s26, 512  }
  0xae   : > { %561 = vsyncadd (%p452_p9), %s325_s26, 4294966784  ;;  %s16_s17 = sadd.s32 1, %s584_s17   ;;  %s733_s12 = smov %s568_s13 }
  0xaf   : > { %p13_p10 = scmp.ge.s32.totalorder %s16_s17, 4   ;;  %s734_s13 = smov %s572_s14 }
  0xb0   : > { %s735_s14 = smov %s661_s25  ;;  %s736_s15 = smov %s580_s16 }
  0xb1   : > { %s737_s16 = smov %s739_s20  ;;  %15 = sbr.rel (!%p13_p10) target bundleno = 4 (0x4), region = 73 }
  0xb6   :  { %331 = vsyncpa [#allocation3], 1 }
  0xb7   :  { %333 = vsyncpa [#allocation3 + $0x1], 1 }

// kernel: smha_forward.4
= control target key start
LH: loop header
LB: loop body
LE: loop exit
PB: predicated region body
PF: predicated region fallthrough
CT: control target
= control target key end

     0   :  { %s3202_s12 = smov 0   ;;  %s4587_s0 = inlined_call_operand.vmem [shape: f32[64,4,8], index: 0, kind: input, shape index: {}]   ;;  %s4588_s1 = inlined_call_operand.vmem [shape: f32[64,4,8], index: 1, kind: input, shape index: {}]   ;;  %s4589_s2 = inlined_call_operand.vmem [shape: f32[64,4,8], index: 2, kind: input, shape index: {}]   ;;  %s4590_s3 = inlined_call_operand.vmem [shape: f32[64,4,8], index: 3, kind: output, shape index: {}]  }
   0x1 LB: > { %s2895_s13 = sadd.s32 4294967295, %s3180_s12   ;;  %p2899_p0 = scmp.ge.s32.totalorder %s3180_s12, 1  ;;  %s3180_s12 = sphi %s3202_s12, %s13_s12  }
   0x2   : > { %p160_p1 = scmp.lt.s32.totalorder %s3180_s12, 3 }
   0x4   : > { %p161_p2 = pnand %p2899_p0, %p160_p1 }
   0x5   : > { %s2900_s14 = sshll.u32 (!%p161_p2), %s2895_s13, 5 }
   0x6   : > { %164 = sbr.rel (%p161_p2) target bundleno = 649 (0x289), region = 32  ;;  %p195_p3 = scmp.lt.s32.totalorder (!%p161_p2), %s2900_s14, 63 }
   0xb   : > { %s4682_s14 = smov (!%p195_p3, %s2900_s14), 63  ;;  %vm314_vm0 = vcmask 64512   ;;  %vm1179_vm1 = vcmask 27648   ;;  %vm1952_vm2 = vcmask 1043456   ;;  %vm1948_vm7 = vcmask 31744  }
   0xc   : > { %s3210_s15 = sshll.u32 %s4682_s14, 2 }
   0xd   : > { %s3216_s18 = scalar_lea.vmem %s4588_s1, %s3210_s15  ;;  %s3222_s21 = scalar_lea.vmem %s4587_s0, %s3210_s15 }
   0xe   : > { %v250_v0 = vld [vmem:[%s3216_s18] sm:$0xf]  ;;  %v252_v1 = vld [vmem:[%s3216_s18 + $0x8] sm:$0xf]  ;;  %v253_v2 = vld [vmem:[%s3216_s18 + $0xc] sm:$0xf]  ;;  %s3644_s24 = scalar_lea.vmem %s4589_s2, %s3210_s15  ;;  %s4518_s27 = scalar_lea.vmem %s4590_s3, %s3210_s15 }
   0xf   : > { %2908 = vmatpush.xpose.msk.msra.mxu0 %vm314_vm0, %v250_v0  ;;  %2912 = vmatpush.xpose.msk.msra.mxu2 %vm314_vm0, %v252_v1  ;;  %v218_v3 = vld [vmem:[%s3222_s21] sm:$0xf]  ;;  %v220_v4 = vld [vmem:[%s3222_s21 + $0x8] sm:$0xf]  ;;  %v221_v5 = vld [vmem:[%s3222_s21 + $0xc] sm:$0xf] }
  0x10   : > { %2914 = vmatpush.xpose.msk.msra.mxu3 %vm314_vm0, %v253_v2  ;;  %v256_v6 = vld [vmem:[%s3216_s18 + $0x18] sm:$0xf]  ;;  %v257_v7 = vld [vmem:[%s3216_s18 + $0x1c] sm:$0xf]  ;;  %v251_v8 = vld [vmem:[%s3216_s18 + $0x4] sm:$0xf] }
  0x11   : > { %v254_v9 = vld [vmem:[%s3216_s18 + $0x10] sm:$0xf]  ;;  %v255_v10 = vld [vmem:[%s3216_s18 + $0x14] sm:$0xf]  ;;  %v261_v11 = vld [vmem:[%s3216_s18 + $0x2c] sm:$0xf]  ;;  %2910 = vmatpush.xpose.msk.msra.mxu1 %vm314_vm0, %v251_v8 }
  0x12   : > { %2909 = vmatmul.msk.f32.vlgmr.msra.gmra.mxu0 %vm314_vm0, %v218_v3  ;;  %2913 = vmatmul.msk.f32.vlgmr.msra.gmra.mxu2 %vm314_vm0, %v220_v4  ;;  %v219_v12 = vld [vmem:[%s3222_s21 + $0x4] sm:$0xf]  ;;  %v258_v13 = vld [vmem:[%s3216_s18 + $0x20] sm:$0xf]  ;;  %v260_v15 = vld [vmem:[%s3216_s18 + $0x28] sm:$0xf] }
  0x13   : > { %2920 = vmatpush.xpose.msk.msrb.mxu2 %vm314_vm0, %v256_v6  ;;  %2915 = vmatmul.msk.f32.vlgmr.msra.gmra.mxu3 %vm314_vm0, %v221_v5  ;;  %v259_v14 = vld [vmem:[%s3216_s18 + $0x24] sm:$0xf]  ;;  %v224_v16 = vld [vmem:[%s3222_s21 + $0x18] sm:$0xf]  ;;  %v222_v17 = vld [vmem:[%s3222_s21 + $0x10] sm:$0xf] }
  0x14   : > { %2922 = vmatpush.xpose.msk.msrb.mxu3 %vm314_vm0, %v257_v7  ;;  %2916 = vmatpush.xpose.msk.msrb.mxu0 %vm314_vm0, %v254_v9  ;;  %v225_v18 = vld [vmem:[%s3222_s21 + $0x1c] sm:$0xf]  ;;  %v264_v19 = vld [vmem:[%s3216_s18 + $0x38] sm:$0xf]  ;;  %v262_v21 = vld [vmem:[%s3216_s18 + $0x30] sm:$0xf] }
  0x15   : > { %2918 = vmatpush.xpose.msk.msrb.mxu1 %vm314_vm0, %v255_v10  ;;  %v265_v20 = vld [vmem:[%s3216_s18 + $0x3c] sm:$0xf]  ;;  %v223_v22 = vld [vmem:[%s3222_s21 + $0x14] sm:$0xf]  ;;  %v226_v24 = vld [vmem:[%s3222_s21 + $0x20] sm:$0xf] }
  0x16   : > { %2911 = vmatmul.msk.f32.vlgmr.msra.gmra.mxu1 %vm314_vm0, %v219_v12  ;;  %v263_v23 = vld [vmem:[%s3216_s18 + $0x34] sm:$0xf]  ;;  %v228_v25 = vld [vmem:[%s3222_s21 + $0x28] sm:$0xf]  ;;  %v229_v26 = vld [vmem:[%s3222_s21 + $0x2c] sm:$0xf] }
  0x17   : > { %2928 = vmatpush.xpose.msk.msra.mxu2 %vm314_vm0, %v260_v15  ;;  %v268_v27 = vld [vmem:[%s3216_s18 + $0x48] sm:$0xf]  ;;  %v266_v28 = vld [vmem:[%s3216_s18 + $0x40] sm:$0xf]  ;;  %v269_v29 = vld [vmem:[%s3216_s18 + $0x4c] sm:$0xf] }
  0x18   : > { %2930 = vmatpush.xpose.msk.msra.mxu3 %vm314_vm0, %v261_v11  ;;  %2924 = vmatpush.xpose.msk.msra.mxu0 %vm314_vm0, %v258_v13  ;;  %v227_v30 = vld [vmem:[%s3222_s21 + $0x24] sm:$0xf]  ;;  %v232_v32 = vld [vmem:[%s3222_s21 + $0x38] sm:$0xf]  ;;  %v230_v33 = vld [vmem:[%s3222_s21 + $0x30] sm:$0xf] }
  0x19   : > { %2926 = vmatpush.xpose.msk.msra.mxu1 %vm314_vm0, %v259_v14  ;;  %v267_v31 = vld [vmem:[%s3216_s18 + $0x44] sm:$0xf]  ;;  %v233_v34 = vld [vmem:[%s3222_s21 + $0x3c] sm:$0xf]  ;;  %v270_v35 = vld [vmem:[%s3216_s18 + $0x50] sm:$0xf] }
  0x1a   : > { %2921 = vmatmul.msk.f32.vlgmr.msrb.gmra.mxu2 %vm314_vm0, %v224_v16  ;;  %2917 = vmatmul.msk.f32.vlgmr.msrb.gmra.mxu0 %vm314_vm0, %v222_v17  ;;  %v272_v36 = vld [vmem:[%s3216_s18 + $0x58] sm:$0xf]  ;;  %v273_v37 = vld [vmem:[%s3216_s18 + $0x5c] sm:$0xf]  ;;  %v231_v38 = vld [vmem:[%s3222_s21 + $0x34] sm:$0xf] }
  0x1b   : > { %2923 = vmatmul.msk.f32.vlgmr.msrb.gmra.mxu3 %vm314_vm0, %v225_v18  ;;  %2936 = vmatpush.xpose.msk.msrb.mxu2 %vm314_vm0, %v264_v19  ;;  %v271_v39 = vld [vmem:[%s3216_s18 + $0x54] sm:$0xf]  ;;  %v236_v40 = vld [vmem:[%s3222_s21 + $0x48] sm:$0xf]  ;;  %v234_v41 = vld [vmem:[%s3222_s21 + $0x40] sm:$0xf] }
  0x1c   : > { %2938 = vmatpush.xpose.msk.msrb.mxu3 %vm314_vm0, %v265_v20  ;;  %2932 = vmatpush.xpose.msk.msrb.mxu0 %vm314_vm0, %v262_v21  ;;  %v237_v42 = vld [vmem:[%s3222_s21 + $0x4c] sm:$0xf]  ;;  %v274_v43 = vld [vmem:[%s3216_s18 + $0x60] sm:$0xf]  ;;  %v276_v44 = vld [vmem:[%s3216_s18 + $0x68] sm:$0xf] }
  0x1d   : > { %v277_v45 = vld [vmem:[%s3216_s18 + $0x6c] sm:$0xf]  ;;  %v235_v46 = vld [vmem:[%s3222_s21 + $0x44] sm:$0xf]  ;;  %v238_v48 = vld [vmem:[%s3222_s21 + $0x50] sm:$0xf] }
  0x1e   : > { %2919 = vmatmul.msk.f32.vlgmr.msrb.gmra.mxu1 %vm314_vm0, %v223_v22  ;;  %v275_v47 = vld [vmem:[%s3216_s18 + $0x64] sm:$0xf]  ;;  %v240_v49 = vld [vmem:[%s3222_s21 + $0x58] sm:$0xf]  ;;  %v241_v50 = vld [vmem:[%s3222_s21 + $0x5c] sm:$0xf] }
  0x1f   : > { %2934 = vmatpush.xpose.msk.msrb.mxu1 %vm314_vm0, %v263_v23  ;;  %v278_v51 = vld [vmem:[%s3216_s18 + $0x70] sm:$0xf]  ;;  %v280_v52 = vld [vmem:[%s3216_s18 + $0x78] sm:$0xf]  ;;  %v281_v53 = vld [vmem:[%s3216_s18 + $0x7c] sm:$0xf] }
  0x20   : > { %v239_v54 = vld [vmem:[%s3222_s21 + $0x54] sm:$0xf]  ;;  %v242_v56 = vld [vmem:[%s3222_s21 + $0x60] sm:$0xf]  ;;  %v244_v57 = vld [vmem:[%s3222_s21 + $0x68] sm:$0xf] }
  0x21   : > { %v279_v55 = vld [vmem:[%s3216_s18 + $0x74] sm:$0xf]  ;;  %v245_v58 = vld [vmem:[%s3222_s21 + $0x6c] sm:$0xf]  ;;  %v243_v59 = vld [vmem:[%s3222_s21 + $0x64] sm:$0xf] }
  0x22   : > { %2925 = vmatmul.msk.f32.vlgmr.msra.gmra.mxu0 %vm314_vm0, %v226_v24  ;;  %2929 = vmatmul.msk.f32.vlgmr.msra.gmra.mxu2 %vm314_vm0, %v228_v25  ;;  %v246_v60 = vld [vmem:[%s3222_s21 + $0x70] sm:$0xf]  ;;  %v248_v61 = vld [vmem:[%s3222_s21 + $0x78] sm:$0xf]  ;;  %v249_v62 = vld [vmem:[%s3222_s21 + $0x7c] sm:$0xf] }
  0x23   : > { %2931 = vmatmul.msk.f32.vlgmr.msra.gmra.mxu3 %vm314_vm0, %v229_v26  ;;  %2944 = vmatpush.xpose.msk.msra.mxu2 %vm314_vm0, %v268_v27  ;;  %v247_v63 = vld [vmem:[%s3222_s21 + $0x74] sm:$0xf] }
  0x24   : > { %2940 = vmatpush.xpose.msk.msra.mxu0 %vm314_vm0, %v266_v28  ;;  %2946 = vmatpush.xpose.msk.msra.mxu3 %vm314_vm0, %v269_v29 }
  0x26   : > { %2927 = vmatmul.msk.f32.vlgmr.msra.gmra.mxu1 %vm314_vm0, %v227_v30 }
  0x27   : > { %2942 = vmatpush.xpose.msk.msra.mxu1 %vm314_vm0, %v267_v31 }
  0x2a   : > { %2937 = vmatmul.msk.f32.vlgmr.msrb.gmra.mxu2 %vm314_vm0, %v232_v32  ;;  %2933 = vmatmul.msk.f32.vlgmr.msrb.gmra.mxu0 %vm314_vm0, %v230_v33 }
  0x2b   : > { %2939 = vmatmul.msk.f32.vlgmr.msrb.gmra.mxu3 %vm314_vm0, %v233_v34  ;;  %2948 = vmatpush.xpose.msk.msrb.mxu0 %vm314_vm0, %v270_v35 }
  0x2c   : > { %2952 = vmatpush.xpose.msk.msrb.mxu2 %vm314_vm0, %v272_v36  ;;  %2954 = vmatpush.xpose.msk.msrb.mxu3 %vm314_vm0, %v273_v37 }
  0x2e   : > { %2935 = vmatmul.msk.f32.vlgmr.msrb.gmra.mxu1 %vm314_vm0, %v231_v38 }
  0x2f   : > { %2950 = vmatpush.xpose.msk.msrb.mxu1 %vm314_vm0, %v271_v39 }
  0x32   : > { %2945 = vmatmul.msk.f32.vlgmr.msra.gmra.mxu2 %vm314_vm0, %v236_v40  ;;  %2941 = vmatmul.msk.f32.vlgmr.msra.gmra.mxu0 %vm314_vm0, %v234_v41 }
  0x33   : > { %2947 = vmatmul.msk.f32.vlgmr.msra.gmra.mxu3 %vm314_vm0, %v237_v42  ;;  %2956 = vmatpush.xpose.msk.msra.mxu0 %vm314_vm0, %v274_v43 }
  0x34   : > { %2960 = vmatpush.xpose.msk.msra.mxu2 %vm314_vm0, %v276_v44  ;;  %2962 = vmatpush.xpose.msk.msra.mxu3 %vm314_vm0, %v277_v45 }
  0x36   : > { %2943 = vmatmul.msk.f32.vlgmr.msra.gmra.mxu1 %vm314_vm0, %v235_v46 }
  0x37   : > { %2958 = vmatpush.xpose.msk.msra.mxu1 %vm314_vm0, %v275_v47 }
  0x3a   : > { %2949 = vmatmul.msk.f32.vlgmr.msrb.gmra.mxu0 %vm314_vm0, %v238_v48  ;;  %2953 = vmatmul.msk.f32.vlgmr.msrb.gmra.mxu2 %vm314_vm0, %v240_v49 }
  0x3b   : > { %2955 = vmatmul.msk.f32.vlgmr.msrb.gmra.mxu3 %vm314_vm0, %v241_v50  ;;  %2964 = vmatpush.xpose.msk.msrb.mxu0 %vm314_vm0, %v278_v51 }
  0x3c   : > { %2968 = vmatpush.xpose.msk.msrb.mxu2 %vm314_vm0, %v280_v52  ;;  %2970 = vmatpush.xpose.msk.msrb.mxu3 %vm314_vm0, %v281_v53 }
  0x3e   : > { %2951 = vmatmul.msk.f32.vlgmr.msrb.gmra.mxu1 %vm314_vm0, %v239_v54 }
  0x3f   : > { %2966 = vmatpush.xpose.msk.msrb.mxu1 %vm314_vm0, %v279_v55 }
  0x42   : > { %2957 = vmatmul.msk.f32.vlgmr.msra.gmra.mxu0 %vm314_vm0, %v242_v56  ;;  %2961 = vmatmul.msk.f32.vlgmr.msra.gmra.mxu2 %vm314_vm0, %v244_v57 }
  0x43   : > { %2963 = vmatmul.msk.f32.vlgmr.msra.gmra.mxu3 %vm314_vm0, %v245_v58 }
  0x46   : > { %2959 = vmatmul.msk.f32.vlgmr.msra.gmra.mxu1 %vm314_vm0, %v243_v59 }
  0x4a   : > { %2965 = vmatmul.msk.f32.vlgmr.msrb.gmra.mxu0 %vm314_vm0, %v246_v60  ;;  %2969 = vmatmul.msk.f32.vlgmr.msrb.gmra.mxu2 %vm314_vm0, %v248_v61 }
  0x4b   : > { %2971 = vmatmul.msk.f32.vlgmr.msrb.gmra.mxu3 %vm314_vm0, %v249_v62 }
  0x4e   : > { %2967 = vmatmul.msk.f32.vlgmr.msrb.gmra.mxu1 %vm314_vm0, %v247_v63 }
  0x8f   : > { %v338_v0 = vpop.f32.mrf.mxu0 }
  0x90   : > { %v3352_v1 = vmul.f32 0.35355338, %v338_v0 }
  0x92   : > { %v1180_v2 = vsel %vm1179_vm1, %v3352_v1, -inf }
  0x93   : > { %1181 = vmax.xlane.f32.xlu1 %v1180_v2  ;;  %v364_v3 = vpop.f32.mrf.mxu1 }
  0x94   : > { %v3356_v4 = vmul.f32 0.35355338, %v364_v3 }
  0x95   : > { %v390_v5 = vpop.f32.mrf.mxu2 }
  0x96   : > { %v3358_v6 = vmul.f32 0.35355338, %v390_v5  ;;  %v416_v7 = vpop.f32.mrf.mxu3  ;;  %v1183_v10 = vsel %vm1179_vm1, %v3356_v4, -inf }
  0x97   : > { %v442_v8 = vpop.f32.mrf.mxu0  ;;  %v3364_v12 = vmul.f32 0.35355338, %v416_v7 }
  0x98   : > { %v1186_v9 = vsel %vm1179_vm1, %v3358_v6, -inf  ;;  %v3376_v22 = vmul.f32 0.35355338, %v442_v8 }
  0x99   : > { %1187 = vmax.xlane.f32.xlu0 %v1186_v9  ;;  %v1189_v17 = vsel %vm1179_vm1, %v3364_v12, -inf }
  0x9a   : > { %v1192_v28 = vsel %vm1179_vm1, %v3376_v22, -inf }
  0x9b   : > { %1184 = vmax.xlane.f32.xlu1 %v1183_v10  ;;  %v468_v11 = vpop.f32.mrf.mxu1 }
  0x9c   : > { %v3366_v13 = vmul.f32 0.35355338, %v468_v11 }
  0x9d   : > { %v494_v14 = vpop.f32.mrf.mxu2 }
  0x9e   : > { %v3368_v15 = vmul.f32 0.35355338, %v494_v14  ;;  %v520_v16 = vpop.f32.mrf.mxu3  ;;  %v1195_v19 = vsel %vm1179_vm1, %v3366_v13, -inf }
  0x9f   : > { %v546_v20 = vpop.f32.mrf.mxu0  ;;  %v3378_v23 = vmul.f32 0.35355338, %v520_v16 }
  0xa0   : > { %v1198_v18 = vsel %vm1179_vm1, %v3368_v15, -inf  ;;  %v3380_v24 = vmul.f32 0.35355338, %v546_v20 }
  0xa1   : > { %1190 = vmax.xlane.f32.xlu0 %v1189_v17  ;;  %1199 = vmax.xlane.f32.xlu2 %v1198_v18  ;;  %v1201_v27 = vsel %vm1179_vm1, %v3378_v23, -inf }
  0xa2   : > { %v1204_v29 = vsel %vm1179_vm1, %v3380_v24, -inf }
  0xa3   : > { %1196 = vmax.xlane.f32.xlu1 %v1195_v19  ;;  %v572_v21 = vpop.f32.mrf.mxu1 }
  0xa4   : > { %v3388_v32 = vmul.f32 0.35355338, %v572_v21 }
  0xa5   : > { %v598_v25 = vpop.f32.mrf.mxu2 }
  0xa6   : > { %v624_v26 = vpop.f32.mrf.mxu3  ;;  %v1207_v37 = vsel %vm1179_vm1, %v3388_v32, -inf  ;;  %v3400_v41 = vmul.f32 0.35355338, %v598_v25 }
  0xa7   : > { %v650_v31 = vpop.f32.mrf.mxu0  ;;  %v3390_v33 = vmul.f32 0.35355338, %v624_v26 }
  0xa8   : > { %v1210_v45 = vsel %vm1179_vm1, %v3400_v41, -inf  ;;  %v3412_v49 = vmul.f32 0.35355338, %v650_v31 }
  0xa9   : > { %1202 = vmax.xlane.f32.xlu2 %v1201_v27  ;;  %1193 = vmax.xlane.f32.xlu0 %v1192_v28  ;;  %v1213_v38 = vsel %vm1179_vm1, %v3390_v33, -inf }
  0xaa   : > { %v1216_v55 = vsel %vm1179_vm1, %v3412_v49, -inf }
  0xab   : > { %1205 = vmax.xlane.f32.xlu1 %v1204_v29  ;;  %v676_v30 = vpop.f32.mrf.mxu1 }
  0xac   : > { %v3402_v42 = vmul.f32 0.35355338, %v676_v30 }
  0xad   : > { %v702_v36 = vpop.f32.mrf.mxu2 }
  0xae   : > { %v728_v34 = vpop.f32.mrf.mxu3  ;;  %v1219_v46 = vsel %vm1179_vm1, %v3402_v42, -inf  ;;  %v3414_v50 = vmul.f32 0.35355338, %v702_v36 }
  0xaf   : > { %v3392_v35 = vmul.f32 0.35355338, %v728_v34  ;;  %v754_v44 = vpop.f32.mrf.mxu0 }
  0xb0   : > { %v1222_v54 = vsel %vm1179_vm1, %v3414_v50, -inf  ;;  %v3426_v58 = vmul.f32 0.35355338, %v754_v44 }
  0xb1   : > { %1208 = vmax.xlane.f32.xlu2 %v1207_v37  ;;  %1214 = vmax.xlane.f32.xlu0 %v1213_v38  ;;  %v1225_v39 = vsel %vm1179_vm1, %v3392_v35, -inf }
  0xb2   : > { %v1228_v0 = vsel %vm1179_vm1, %v3426_v58, -inf }
  0xb3   : > { %1226 = vmax.xlane.f32.xlu1 %v1225_v39  ;;  %v780_v40 = vpop.f32.mrf.mxu1 }
  0xb4   : > { %v3404_v43 = vmul.f32 0.35355338, %v780_v40 }
  0xb5   : > { %v806_v48 = vpop.f32.mrf.mxu2 }
  0xb6   : > { %v1231_v47 = vsel %vm1179_vm1, %v3404_v43, -inf  ;;  %v3416_v51 = vmul.f32 0.35355338, %v806_v48  ;;  %v832_v52 = vpop.f32.mrf.mxu3 }
  0xb7   : > { %v858_v53 = vpop.f32.mrf.mxu0  ;;  %v3424_v57 = vmul.f32 0.35355338, %v832_v52 }
  0xb8   : > { %v1234_v56 = vsel %vm1179_vm1, %v3416_v51, -inf  ;;  %v3428_v59 = vmul.f32 0.35355338, %v858_v53 }
  0xb9   : > { %1211 = vmax.xlane.f32.xlu2 %v1210_v45  ;;  %1220 = vmax.xlane.f32.xlu0 %v1219_v46  ;;  %v1237_v61 = vsel %vm1179_vm1, %v3424_v57, -inf }
  0xba   : > { %v1240_v2 = vsel %vm1179_vm1, %v3428_v59, -inf }
  0xbb   : > { %1232 = vmax.xlane.f32.xlu1 %v1231_v47  ;;  %v884_v62 = vpop.f32.mrf.mxu1 }
  0xbc   : > { %v3436_v5 = vmul.f32 0.35355338, %v884_v62 }
  0xbd   : > { %v910_v60 = vpop.f32.mrf.mxu2 }
  0xbe   : > { %v936_v63 = vpop.f32.mrf.mxu3  ;;  %v1243_v9 = vsel %vm1179_vm1, %v3436_v5, -inf  ;;  %v3450_v19 = vmul.f32 0.35355338, %v910_v60 }
  0xbf   : > { %v962_v3 = vpop.f32.mrf.mxu0  ;;  %v3438_v7 = vmul.f32 0.35355338, %v936_v63 }
  0xc0   : > { %v3440_v8 = vmul.f32 0.35355338, %v962_v3  ;;  %v1246_v26 = vsel %vm1179_vm1, %v3450_v19, -inf }
  0xc1   : > { %1223 = vmax.xlane.f32.xlu0 %v1222_v54  ;;  %1217 = vmax.xlane.f32.xlu2 %v1216_v55  ;;  %v1249_v10 = vsel %vm1179_vm1, %v3438_v7, -inf }
  0xc2   : > { %v1252_v16 = vsel %vm1179_vm1, %v3440_v8, -inf }
  0xc3   : > { %1235 = vmax.xlane.f32.xlu1 %v1234_v56  ;;  %v988_v14 = vpop.f32.mrf.mxu1 }
  0xc4   : > { %v3462_v30 = vmul.f32 0.35355338, %v988_v14 }
  0xc5   : > { %v1014_v11 = vpop.f32.mrf.mxu2 }
  0xc6   : > { %v1040_v17 = vpop.f32.mrf.mxu3  ;;  %v3448_v18 = vmul.f32 0.35355338, %v1014_v11  ;;  %v1255_v37 = vsel %vm1179_vm1, %v3462_v30, -inf }
  0xc7   : > { %v3452_v20 = vmul.f32 0.35355338, %v1040_v17  ;;  %v1066_v25 = vpop.f32.mrf.mxu0 }
  0xc8   : > { %v1258_v21 = vsel %vm1179_vm1, %v3448_v18, -inf  ;;  %v3460_v29 = vmul.f32 0.35355338, %v1066_v25 }
  0xc9   : > { %1238 = vmax.xlane.f32.xlu2 %v1237_v61  ;;  %1229 = vmax.xlane.f32.xlu0 %v1228_v0  ;;  %v1261_v27 = vsel %vm1179_vm1, %v3452_v20, -inf }
  0xca   : > { %v1264_v34 = vsel %vm1179_vm1, %v3460_v29, -inf }
  0xcb   : > { %1241 = vmax.xlane.f32.xlu1 %v1240_v2  ;;  %v1092_v28 = vpop.f32.mrf.mxu1 }
  0xcc   : > { %v3464_v31 = vmul.f32 0.35355338, %v1092_v28 }
  0xcd   : > { %v1118_v36 = vpop.f32.mrf.mxu2 }
  0xce   : > { %v1267_v38 = vsel %vm1179_vm1, %v3464_v31, -inf  ;;  %v1144_v39 = vpop.f32.mrf.mxu3  ;;  %v3472_v40 = vmul.f32 0.35355338, %v1118_v36 }
  0xcf   : > { %v3474_v44 = vmul.f32 0.35355338, %v1144_v39 }
  0xd0   : > { %v1270_v45 = vsel %vm1179_vm1, %v3472_v40, -inf }
  0xd1   : > { %1244 = vmax.xlane.f32.xlu2 %v1243_v9  ;;  %1250 = vmax.xlane.f32.xlu0 %v1249_v10  ;;  %v1273_v46 = vsel %vm1179_vm1, %v3474_v44, -inf }
  0xd3   : > { %1253 = vmax.xlane.f32.xlu1 %v1252_v16 }
  0xd9   : > { %1247 = vmax.xlane.f32.xlu2 %v1246_v26  ;;  %1259 = vmax.xlane.f32.xlu0 %v1258_v21 }
  0xdb   : > { %1262 = vmax.xlane.f32.xlu1 %v1261_v27 }
  0xe1   : > { %1256 = vmax.xlane.f32.xlu2 %v1255_v37  ;;  %1265 = vmax.xlane.f32.xlu0 %v1264_v34 }
  0xe3   : > { %1268 = vmax.xlane.f32.xlu1 %v1267_v38 }
  0xe9   : > { %1271 = vmax.xlane.f32.xlu0 %v1270_v45 }
  0xeb   : > { %1274 = vmax.xlane.f32.xlu1 %v1273_v46 }
 0x106   : > { %v1182_v47 = vpop.xlane.xlu1 %1181 }
 0x107   : > { %v1276_v48 = vsub.f32 %v3352_v1, %v1182_v47 }
 0x109   : > { %v1308_v52 = vmul.f32 1.442695, %v1276_v48 }
 0x10b   : > { %3046 = vpow2.f32 %v1308_v52 }
 0x10c   : > { %v1188_v53 = vpop.xlane.xlu0 %1187 }
 0x10d   : > { %v1278_v54 = vsub.f32 %v3358_v6, %v1188_v53 }
 0x10e   : > { %v1185_v55 = vpop.xlane.xlu1 %1184 }
 0x10f   : > { %v1312_v56 = vmul.f32 1.442695, %v1278_v54  ;;  %v1277_v60 = vsub.f32 %v3356_v4, %v1185_v55 }
 0x111   : > { %v3483_v61 = vpop.eup %3046  ;;  %3048 = vpow2.f32 %v1312_v56  ;;  %v1310_v62 = vmul.f32 1.442695, %v1277_v60 }
 0x112   : > { %v1372_v63 = vsel %vm1179_vm1, %v3483_v61, 0.0 }
 0x113   : > { %3050 = vpow2.f32 %v1310_v62  ;;  %1373 = vadd.xlane.f32.xlu2 %v1372_v63 }
 0x114   : > { %v1191_v0 = vpop.xlane.xlu0 %1190  ;;  %v1200_v1 = vpop.xlane.xlu2 %1199 }
 0x115   : > { %v1279_v2 = vsub.f32 %v3364_v12, %v1191_v0  ;;  %v1282_v3 = vsub.f32 %v3368_v15, %v1200_v1 }
 0x116   : > { %v1197_v6 = vpop.xlane.xlu1 %1196 }
 0x117   : > { %v3489_v9 = vpop.eup %3048  ;;  %v1314_v10 = vmul.f32 1.442695, %v1279_v2  ;;  %v1320_v4 = vmul.f32 1.442695, %v1282_v3  ;;  %v1281_v14 = vsub.f32 %v3366_v13, %v1197_v6 }
 0x118   : > { %v1378_v16 = vsel %vm1179_vm1, %v3489_v9, 0.0 }
 0x119   : > { %v3491_v11 = vpop.eup %3050  ;;  %3052 = vpow2.f32 %v1314_v10  ;;  %v1318_v21 = vmul.f32 1.442695, %v1281_v14 }
 0x11a   : > { %3054 = vpow2.f32 %v1320_v4  ;;  %v1375_v17 = vsel %vm1179_vm1, %v3491_v11, 0.0 }
 0x11b   : > { %1379 = vadd.xlane.f32.xlu2 %v1378_v16  ;;  %1376 = vadd.xlane.f32.xlu0 %v1375_v17  ;;  %3056 = vpow2.f32 %v1318_v21 }
 0x11c   : > { %v1203_v12 = vpop.xlane.xlu2 %1202  ;;  %v1194_v15 = vpop.xlane.xlu0 %1193 }
 0x11d   : > { %v1280_v25 = vsub.f32 %v3376_v22, %v1194_v15  ;;  %v1283_v28 = vsub.f32 %v3378_v23, %v1203_v12 }
 0x11e   : > { %v1206_v26 = vpop.xlane.xlu1 %1205 }
 0x11f   : > { %v3499_v27 = vpop.eup %3052  ;;  %v1316_v13 = vmul.f32 1.442695, %v1280_v25  ;;  %v1284_v36 = vsub.f32 %v3380_v24, %v1206_v26  ;;  %v1322_v22 = vmul.f32 1.442695, %v1283_v28 }
 0x120   : > { %v3502_v34 = vpop.eup %3054  ;;  %v1381_v38 = vsel %vm1179_vm1, %v3499_v27, 0.0 }
 0x121   : > { %v1390_v37 = vsel %vm1179_vm1, %v3502_v34, 0.0  ;;  %3058 = vpow2.f32 %v1316_v13  ;;  %v1324_v39 = vmul.f32 1.442695, %v1284_v36  ;;  %v3510_v48 = vpop.eup %3056 }
 0x122   : > { %1391 = vadd.xlane.f32.xlu1 %v1390_v37  ;;  %3060 = vpow2.f32 %v1322_v22 }
 0x123   : > { %1382 = vadd.xlane.f32.xlu0 %v1381_v38  ;;  %3062 = vpow2.f32 %v1324_v39 }
 0x124   : > { %v1209_v45 = vpop.xlane.xlu2 %1208  ;;  %v1215_v46 = vpop.xlane.xlu0 %1214 }
 0x125   : > { %v1285_v23 = vsub.f32 %v3388_v32, %v1209_v45  ;;  %v1287_v52 = vsub.f32 %v3390_v33, %v1215_v46  ;;  %v1387_v32 = vsel %vm1179_vm1, %v3510_v48, 0.0 }
 0x126   : > { %v1227_v47 = vpop.xlane.xlu1 %1226 }
 0x127   : > { %v1326_v24 = vmul.f32 1.442695, %v1285_v23  ;;  %v3513_v53 = vpop.eup %3058  ;;  %v1291_v54 = vsub.f32 %v3392_v35, %v1227_v47  ;;  %v1330_v56 = vmul.f32 1.442695, %v1287_v52 }
 0x128   : > { %v1384_v55 = vsel %vm1179_vm1, %v3513_v53, 0.0  ;;  %v3520_v0 = vpop.eup %3060 }
 0x129   : > { %3064 = vpow2.f32 %v1326_v24  ;;  %1385 = vadd.xlane.f32.xlu2 %v1384_v55  ;;  %v1338_v60 = vmul.f32 1.442695, %v1291_v54  ;;  %v3523_v1 = vpop.eup %3062  ;;  %v1393_v14 = vsel %vm1179_vm1, %v3520_v0, 0.0 }
 0x12a   : > { %3066 = vpow2.f32 %v1330_v56 }
 0x12b   : > { %1388 = vadd.xlane.f32.xlu0 %v1387_v32  ;;  %3068 = vpow2.f32 %v1338_v60 }
 0x12c   : > { %v1212_v62 = vpop.xlane.xlu2 %1211  ;;  %v1221_v63 = vpop.xlane.xlu0 %1220 }
 0x12d   : > { %v1286_v33 = vsub.f32 %v3400_v41, %v1212_v62  ;;  %v1289_v6 = vsub.f32 %v3402_v42, %v1221_v63  ;;  %v1396_v41 = vsel %vm1179_vm1, %v3523_v1, 0.0 }
 0x12e   : > { %v1233_v35 = vpop.xlane.xlu1 %1232 }
 0x12f   : > { %v3525_v2 = vpop.eup %3064  ;;  %v1328_v3 = vmul.f32 1.442695, %v1286_v33  ;;  %v1293_v4 = vsub.f32 %v3404_v43, %v1233_v35  ;;  %v1334_v16 = vmul.f32 1.442695, %v1289_v6 }
 0x130   : > { %v1399_v10 = vsel %vm1179_vm1, %v3525_v2, 0.0  ;;  %v3535_v15 = vpop.eup %3066 }
 0x131   : > { %3070 = vpow2.f32 %v1328_v3  ;;  %1400 = vadd.xlane.f32.xlu1 %v1399_v10  ;;  %1394 = vadd.xlane.f32.xlu2 %v1393_v14  ;;  %v1342_v42 = vmul.f32 1.442695, %v1293_v4  ;;  %v3538_v25 = vpop.eup %3068  ;;  %v1405_v38 = vsel %vm1179_vm1, %v3535_v15, 0.0 }
 0x132   : > { %3072 = vpow2.f32 %v1334_v16 }
 0x133   : > { %1397 = vadd.xlane.f32.xlu0 %v1396_v41  ;;  %3074 = vpow2.f32 %v1342_v42 }
 0x134   : > { %v1224_v17 = vpop.xlane.xlu0 %1223  ;;  %v1218_v12 = vpop.xlane.xlu2 %1217 }
 0x135   : > { %v1288_v21 = vsub.f32 %v3412_v49, %v1218_v12  ;;  %v1290_v28 = vsub.f32 %v3414_v50, %v1224_v17  ;;  %v1417_v49 = vsel %vm1179_vm1, %v3538_v25, 0.0 }
 0x136   : > { %v1236_v43 = vpop.xlane.xlu1 %1235 }
 0x137   : > { %v3540_v26 = vpop.eup %3070  ;;  %v1332_v13 = vmul.f32 1.442695, %v1288_v21  ;;  %v1294_v36 = vsub.f32 %v3416_v51, %v1236_v43  ;;  %v1336_v22 = vmul.f32 1.442695, %v1290_v28 }
 0x138   : > { %v1402_v37 = vsel %vm1179_vm1, %v3540_v26, 0.0  ;;  %v3551_v46 = vpop.eup %3072 }
 0x139   : > { %1403 = vadd.xlane.f32.xlu1 %v1402_v37  ;;  %3076 = vpow2.f32 %v1332_v13  ;;  %1406 = vadd.xlane.f32.xlu2 %v1405_v38  ;;  %v1344_v50 = vmul.f32 1.442695, %v1294_v36  ;;  %v3553_v47 = vpop.eup %3074  ;;  %v1411_v32 = vsel %vm1179_vm1, %v3551_v46, 0.0 }
 0x13a   : > { %3078 = vpow2.f32 %v1336_v22  ;;  %v1423_v56 = vsel %vm1179_vm1, %v3553_v47, 0.0 }
 0x13b   : > { %1418 = vadd.xlane.f32.xlu0 %v1417_v49  ;;  %3080 = vpow2.f32 %v1344_v50 }
 0x13c   : > { %v1239_v39 = vpop.xlane.xlu2 %1238  ;;  %v1230_v45 = vpop.xlane.xlu0 %1229 }
 0x13d   : > { %v1295_v51 = vsub.f32 %v3424_v57, %v1239_v39  ;;  %v1292_v52 = vsub.f32 %v3426_v58, %v1230_v45 }
 0x13e   : > { %v1242_v23 = vpop.xlane.xlu1 %1241 }
 0x13f   : > { %v1346_v24 = vmul.f32 1.442695, %v1295_v51  ;;  %v3556_v54 = vpop.eup %3076  ;;  %v1296_v55 = vsub.f32 %v3428_v59, %v1242_v23  ;;  %v1340_v60 = vmul.f32 1.442695, %v1292_v52 }
 0x140   : > { %v1408_v57 = vsel %vm1179_vm1, %v3556_v54, 0.0  ;;  %v3565_v33 = vpop.eup %3078 }
 0x141   : > { %3082 = vpow2.f32 %v1346_v24  ;;  %1412 = vadd.xlane.f32.xlu2 %v1411_v32  ;;  %1409 = vadd.xlane.f32.xlu1 %v1408_v57  ;;  %v1348_v58 = vmul.f32 1.442695, %v1296_v55  ;;  %v3568_v35 = vpop.eup %3080  ;;  %v1414_v41 = vsel %vm1179_vm1, %v3565_v33, 0.0 }
 0x142   : > { %3084 = vpow2.f32 %v1340_v60 }
 0x143   : > { %1424 = vadd.xlane.f32.xlu0 %v1423_v56  ;;  %3086 = vpow2.f32 %v1348_v58 }
 0x144   : > { %v1245_v62 = vpop.xlane.xlu2 %1244  ;;  %v1251_v63 = vpop.xlane.xlu0 %1250 }
 0x145   : > { %v1297_v59 = vsub.f32 %v3436_v5, %v1245_v62  ;;  %v1299_v4 = vsub.f32 %v3438_v7, %v1251_v63  ;;  %v1426_v5 = vsel %vm1179_vm1, %v3568_v35, 0.0 }
 0x146   : > { %v1254_v3 = vpop.xlane.xlu1 %1253 }
 0x147   : > { %v3570_v6 = vpop.eup %3082  ;;  %v1350_v10 = vmul.f32 1.442695, %v1297_v59  ;;  %v1354_v16 = vmul.f32 1.442695, %v1299_v4  ;;  %v1300_v13 = vsub.f32 %v3440_v8, %v1254_v3 }
 0x148   : > { %v1429_v14 = vsel %vm1179_vm1, %v3570_v6, 0.0  ;;  %v3579_v42 = vpop.eup %3084 }
 0x149   : > { %3088 = vpow2.f32 %v1350_v10  ;;  %1415 = vadd.xlane.f32.xlu2 %v1414_v41  ;;  %1430 = vadd.xlane.f32.xlu1 %v1429_v14  ;;  %v3582_v21 = vpop.eup %3086  ;;  %v1356_v8 = vmul.f32 1.442695, %v1300_v13 }
 0x14a   : > { %3090 = vpow2.f32 %v1354_v16  ;;  %v1432_v50 = vsel %vm1179_vm1, %v3582_v21, 0.0 }
 0x14b   : > { %1427 = vadd.xlane.f32.xlu0 %v1426_v5 }
 0x14c   : > { %v1248_v17 = vpop.xlane.xlu2 %1247  ;;  %v1260_v12 = vpop.xlane.xlu0 %1259 }
 0x14d   : > { %v1298_v7 = vsub.f32 %v3450_v19, %v1248_v17  ;;  %v1302_v38 = vsub.f32 %v3448_v18, %v1260_v12  ;;  %v1420_v19 = vsel %vm1179_vm1, %v3579_v42, 0.0 }
 0x14e   : > { %v1263_v43 = vpop.xlane.xlu1 %1262 }
 0x14f   : > { %v3584_v28 = vpop.eup %3088  ;;  %v1352_v36 = vmul.f32 1.442695, %v1298_v7  ;;  %v1303_v37 = vsub.f32 %v3452_v20, %v1263_v43  ;;  %v1360_v20 = vmul.f32 1.442695, %v1302_v38  ;;  %v282_v38 = vld [vmem:[%s3644_s24] sm:$0xf] }
 0x150   : > { %v1435_v49 = vsel %vm1179_vm1, %v3584_v28, 0.0  ;;  %v3595_v18 = vpop.eup %3090  ;;  %2972 = vmatpush.msk.msra.mxu0 %vm1952_vm2, %v282_v38  ;;  %v287_v38 = vld [vmem:[%s3644_s24 + $0x14] sm:$0xf] }
 0x151   : > { %3092 = vpow2.f32 %v1352_v36  ;;  %v1362_v22 = vmul.f32 1.442695, %v1303_v37  ;;  %1421 = vadd.xlane.f32.xlu2 %v1420_v19  ;;  %1436 = vadd.xlane.f32.xlu1 %v1435_v49  ;;  %v1441_v32 = vsel %vm1179_vm1, %v3595_v18, 0.0  ;;  %v283_v49 = vld [vmem:[%s3644_s24 + $0x4] sm:$0xf] }
 0x152   : > { %2974 = vmatpush.msk.msra.mxu1 %vm1952_vm2, %v283_v49 }
 0x153   : > { %3094 = vpow2.f32 %v1362_v22  ;;  %1433 = vadd.xlane.f32.xlu0 %v1432_v50  ;;  %v284_v22 = vld [vmem:[%s3644_s24 + $0x8] sm:$0xf] }
 0x154   : > { %v1266_v39 = vpop.xlane.xlu0 %1265  ;;  %v1257_v45 = vpop.xlane.xlu2 %1256  ;;  %3096 = vpow2.f32 %v1356_v8  ;;  %2976 = vmatpush.msk.msra.mxu2 %vm1952_vm2, %v284_v22  ;;  %2982 = vmatpush.msk.msrb.mxu1 %vm1952_vm2, %v287_v38 }
 0x155   : > { %3098 = vpow2.f32 %v1360_v20  ;;  %v1301_v24 = vsub.f32 %v3462_v30, %v1257_v45  ;;  %v1304_v4 = vsub.f32 %v3460_v29, %v1266_v39  ;;  %v285_v45 = vld [vmem:[%s3644_s24 + $0xc] sm:$0xf] }
 0x156   : > { %v1269_v51 = vpop.xlane.xlu1 %1268  ;;  %2978 = vmatpush.msk.msra.mxu3 %vm1952_vm2, %v285_v45 }
 0x157   : > { %v3597_v23 = vpop.eup %3092  ;;  %v1358_v56 = vmul.f32 1.442695, %v1301_v24  ;;  %v1305_v59 = vsub.f32 %v3464_v31, %v1269_v51  ;;  %v1364_v16 = vmul.f32 1.442695, %v1304_v4  ;;  %v288_v51 = vld [vmem:[%s3644_s24 + $0x18] sm:$0xf] }
 0x158   : > { %v1438_v52 = vsel %vm1179_vm1, %v3597_v23, 0.0  ;;  %2984 = vmatpush.msk.msrb.mxu2 %vm1952_vm2, %v288_v51 }
 0x159   : > { %v3602_v55 = vpop.eup %3094  ;;  %1442 = vadd.xlane.f32.xlu2 %v1441_v32  ;;  %1439 = vadd.xlane.f32.xlu1 %v1438_v52  ;;  %3100 = vpow2.f32 %v1358_v56 }
 0x15a   : > { %v1453_v57 = vsel %vm1179_vm1, %v3602_v55, 0.0  ;;  %v3608_v58 = vpop.eup %3096 }
 0x15b   : > { %1454 = vadd.xlane.f32.xlu0 %v1453_v57  ;;  %v3611_v62 = vpop.eup %3098  ;;  %v1444_v5 = vsel %vm1179_vm1, %v3608_v58, 0.0 }
 0x15c   : > { %v1272_v60 = vpop.xlane.xlu0 %1271  ;;  %v1450_v41 = vsel %vm1179_vm1, %v3611_v62, 0.0 }
 0x15d   : > { %v1306_v30 = vsub.f32 %v3472_v40, %v1272_v60  ;;  %v1366_v40 = vmul.f32 1.442695, %v1305_v59 }
 0x15e   : > { %v1275_v63 = vpop.xlane.xlu1 %1274 }
 0x15f   : > { %v1368_v3 = vmul.f32 1.442695, %v1306_v30  ;;  %v1307_v10 = vsub.f32 %v3474_v44, %v1275_v63  ;;  %v3620_v31 = vpop.eup %3100 }
 0x160   : > { %v1447_v12 = vsel %vm1179_vm1, %v3620_v31, 0.0 }
 0x161   : > { %3102 = vpow2.f32 %v1368_v3  ;;  %v1370_v14 = vmul.f32 1.442695, %v1307_v10  ;;  %1451 = vadd.xlane.f32.xlu2 %v1450_v41  ;;  %1445 = vadd.xlane.f32.xlu1 %v1444_v5  ;;  %v286_v5 = vld [vmem:[%s3644_s24 + $0x10] sm:$0xf] }
 0x162   : > { %2980 = vmatpush.msk.msrb.mxu0 %vm1952_vm2, %v286_v5 }
 0x163   : > { %3104 = vpow2.f32 %v1370_v14 }
 0x164   : > { %3106 = vpow2.f32 %v1366_v40 }
 0x165   : > { %3108 = vpow2.f32 %v1364_v16 }
 0x167   : > { %v3622_v17 = vpop.eup %3102 }
 0x168   : > { %v1462_v29 = vsel %vm1179_vm1, %v3622_v17, 0.0 }
 0x169   : > { %v3626_v44 = vpop.eup %3104  ;;  %1463 = vadd.xlane.f32.xlu0 %v1462_v29  ;;  %1448 = vadd.xlane.f32.xlu2 %v1447_v12 }
 0x16a   : > { %v1465_v7 = vsel %vm1179_vm1, %v3626_v44, 0.0  ;;  %v3632_v43 = vpop.eup %3106 }
 0x16b   : > { %1466 = vadd.xlane.f32.xlu1 %v1465_v7  ;;  %v3634_v13 = vpop.eup %3108  ;;  %v1459_v36 = vsel %vm1179_vm1, %v3632_v43, 0.0 }
 0x16c   : > { %v1456_v37 = vsel %vm1179_vm1, %v3634_v13, 0.0 }
 0x171   : > { %1460 = vadd.xlane.f32.xlu0 %v1459_v36  ;;  %1457 = vadd.xlane.f32.xlu2 %v1456_v37 }
 0x186   : > { %v1374_v19 = vpop.xlane.xlu2 %1373 }
 0x187   : > { %3110 = vrcp.f32 %v1374_v19  ;;  %v1479_v52 = vand.u32 2147483648, %v1374_v19  ;;  %v1477_v57 = vand.u32 2147483647, %v1374_v19  ;;  %vm1473_vm4 = vweird.f32 %v1374_v19 }
 0x189   : > { %v1480_v30 = vor.u32 1.1754944e-38, %v1479_v52  ;;  %vm1478_vm6 = vcmp.eq.f32.partialorder %v1477_v57, 8.507059e+37 }
 0x18d   : > { %v3111_v50 = vpop.eup %3110 }
 0x18e   : > { %v1469_v8 = vmul.f32 %v3111_v50, %v1374_v19  ;;  %v1380_v20 = vpop.xlane.xlu2 %1379  ;;  %v1377_v39 = vpop.xlane.xlu0 %1376  ;;  %vm1474_vm3 = vweird.f32 %v3111_v50 }
 0x18f   : > { %3112 = vrcp.f32 %v1380_v20  ;;  %vm1475_vm5 = vmor %vm1473_vm4, %vm1474_vm3  ;;  %v1507_v16 = vand.u32 2147483647, %v1380_v20  ;;  %v1509_v29 = vand.u32 2147483648, %v1380_v20  ;;  %v1494_v36 = vand.u32 2147483648, %v1377_v39 }
 0x190   : > { %v1470_v24 = vsub.f32 1.0, %v1469_v8  ;;  %3114 = vrcp.f32 %v1377_v39  ;;  %v1492_v22 = vand.u32 2147483647, %v1377_v39  ;;  %vm1503_vm10 = vweird.f32 %v1380_v20 }
 0x191   : > { %vm3674_vm12 = vcmp.eq.f32.partialorder %v1507_v16, 8.507059e+37  ;;  %vm1488_vm13 = vweird.f32 %v1377_v39  ;;  %v1495_v57 = vor.u32 1.1754944e-38, %v1494_v36 }
 0x192   : > { %v1471_v32 = vmul.f32 %v3111_v50, %v1470_v24  ;;  %vm1493_vm15 = vcmp.eq.f32.partialorder %v1492_v22, 8.507059e+37  ;;  %v290_v22 = vld [vmem:[%s3644_s24 + $0x20] sm:$0xf] }
 0x194   : > { %v1472_v56 = vadd.f32 %v3111_v50, %v1471_v32  ;;  %v1510_v32 = vor.u32 1.1754944e-38, %v1509_v29 }
 0x195   : > { %v3113_v60 = vpop.eup %3112  ;;  %v3656_v63 = vpop.xlane.xlu1 %1391 }
 0x196   : > { %v3115_v59 = vpop.eup %3114  ;;  %v1476_v3 = vsel %vm1475_vm5, %v3111_v50, %v1472_v56  ;;  %v1499_v10 = vmul.f32 %v3113_v60, %v1380_v20  ;;  %3116 = vrcp.f32 %v3656_v63  ;;  %v3659_v4 = vpop.xlane.xlu0 %1382  ;;  %vm1504_vm8 = vweird.f32 %v3113_v60 }
 0x197   : > { %v1481_v14 = vsel %vm1478_vm6, %v1480_v30, %v1476_v3  ;;  %v1484_v41 = vmul.f32 %v3115_v59, %v1377_v39  ;;  %3118 = vrcp.f32 %v3659_v4  ;;  %vm1489_vm9 = vweird.f32 %v3115_v59  ;;  %vm3670_vm11 = vmor %vm1503_vm10, %vm1504_vm8 }
 0x198   : > { %v1500_v40 = vsub.f32 1.0, %v1499_v10  ;;  %v1482_v37 = vmul.f32 %v3483_v61, %v1481_v14  ;;  %vm1490_vm14 = vmor %vm1488_vm13, %vm1489_vm9  ;;  %v1524_v16 = vand.u32 2147483648, %v3659_v4  ;;  %vm1563_vm3 = vweird.f32 %v3656_v63 }
 0x199   : > { %v1485_v12 = vsub.f32 1.0, %v1484_v41  ;;  %v1567_v41 = vand.u32 2147483647, %v3656_v63  ;;  %v1522_v38 = vand.u32 2147483647, %v3659_v4  ;;  %vm1518_vm5 = vweird.f32 %v3659_v4 }
 0x19a   : > { %v1501_v7 = vmul.f32 %v3113_v60, %v1500_v40  ;;  %2973 = vmatmul.msk.f32.vlgmr.msra.gmra.mxu0 %vm1948_vm7, %v1482_v37  ;;  %v289_v40 = vld [vmem:[%s3644_s24 + $0x1c] sm:$0xf] }
 0x19b   : > { %v1486_v49 = vmul.f32 %v3115_v59, %v1485_v12  ;;  %2986 = vmatpush.msk.msrb.mxu3 %vm1952_vm2, %v289_v40  ;;  %2988 = vmatpush.msk.msra.mxu0 %vm1952_vm2, %v290_v22  ;;  %vm1568_vm8 = vcmp.eq.f32.partialorder %v1567_v41, 8.507059e+37  ;;  %vm1523_vm9 = vcmp.eq.f32.partialorder %v1522_v38, 8.507059e+37  ;;  %v292_v41 = vld [vmem:[%s3644_s24 + $0x28] sm:$0xf]  ;;  %v293_v40 = vld [vmem:[%s3644_s24 + $0x2c] sm:$0xf] }
 0x19c   : > { %v3667_v19 = vpop.eup %3116  ;;  %v1502_v50 = vadd.f32 %v3113_v60, %v1501_v7  ;;  %v3680_v24 = vpop.xlane.xlu2 %1385 }
 0x19d   : > { %v1487_v61 = vadd.f32 %v3115_v59, %v1486_v49  ;;  %v1559_v51 = vmul.f32 %v3667_v19, %v3656_v63  ;;  %v3119_v52 = vpop.eup %3118  ;;  %3120 = vrcp.f32 %v3680_v24  ;;  %vm1564_vm0 = vweird.f32 %v3667_v19 }
 0x19e   : > { %v1506_v20 = vsel %vm3670_vm11, %v3113_v60, %v1502_v50  ;;  %v3686_v56 = vpop.xlane.xlu0 %1388  ;;  %v1514_v3 = vmul.f32 %v3119_v52, %v3659_v4  ;;  %vm1519_vm1 = vweird.f32 %v3119_v52  ;;  %vm3713_vm4 = vmor %vm1563_vm3, %vm1564_vm0  ;;  %vm1533_vm10 = vweird.f32 %v3680_v24 }
 0x19f   : > { %v1491_v30 = vsel %vm1490_vm14, %v3115_v59, %v1487_v61  ;;  %v1560_v39 = vsub.f32 1.0, %v1559_v51  ;;  %v1511_v10 = vsel %vm3674_vm12, %v1510_v32, %v1506_v20  ;;  %3122 = vrcp.f32 %v3686_v56  ;;  %vm1520_vm6 = vmor %vm1518_vm5, %vm1519_vm1 }
 0x1a0   : > { %v1496_v14 = vsel %vm1493_vm15, %v1495_v57, %v1491_v30  ;;  %v1515_v5 = vsub.f32 1.0, %v1514_v3  ;;  %v1569_v59 = vand.u32 2147483648, %v3656_v63  ;;  %v1512_v36 = vmul.f32 %v3489_v9, %v1511_v10 }
 0x1a1   : > { %v1561_v60 = vmul.f32 %v3667_v19, %v1560_v39  ;;  %v1497_v29 = vmul.f32 %v3491_v11, %v1496_v14  ;;  %v291_v11 = vld [vmem:[%s3644_s24 + $0x24] sm:$0xf]  ;;  %v1525_v20 = vor.u32 1.1754944e-38, %v1524_v16  ;;  %v1554_v38 = vand.u32 2147483648, %v3686_v56 }
 0x1a2   : > { %v1516_v7 = vmul.f32 %v3119_v52, %v1515_v5  ;;  %2977 = vmatmul.msk.f32.vlgmr.msra.gmra.mxu2 %vm1948_vm7, %v1512_v36  ;;  %v1570_v61 = vor.u32 1.1754944e-38, %v1569_v59  ;;  %v1539_v36 = vand.u32 2147483648, %v3680_v24  ;;  %vm1548_vm14 = vweird.f32 %v3686_v56 }
 0x1a3   : > { %v1562_v12 = vadd.f32 %v3667_v19, %v1561_v60  ;;  %v3702_v37 = vpop.eup %3120  ;;  %2975 = vmatmul.msk.f32.vlgmr.msra.gmra.mxu1 %vm1948_vm7, %v1497_v29  ;;  %2992 = vmatpush.msk.msra.mxu2 %vm1952_vm2, %v292_v41 }
 0x1a4   : > { %v3707_v49 = vpop.xlane.xlu1 %1400  ;;  %v1517_v8 = vadd.f32 %v3119_v52, %v1516_v7  ;;  %v1529_v9 = vmul.f32 %v3702_v37, %v3680_v24  ;;  %v3721_v63 = vpop.xlane.xlu2 %1394  ;;  %2990 = vmatpush.msk.msra.mxu1 %vm1952_vm2, %v291_v11  ;;  %vm1534_vm11 = vweird.f32 %v3702_v37  ;;  %v1537_v7 = vand.u32 2147483647, %v3680_v24 }
 0x1a5   : > { %v1566_v45 = vsel %vm3713_vm4, %v3667_v19, %v1562_v12  ;;  %3124 = vrcp.f32 %v3721_v63  ;;  %v3730_v4 = vpop.eup %3122  ;;  %vm3775_vm13 = vmor %vm1533_vm10, %vm1534_vm11  ;;  %vm1578_vm3 = vweird.f32 %v3721_v63  ;;  %vm1608_vm5 = vweird.f32 %v3707_v49 }
 0x1a6   : > { %v1521_v51 = vsel %vm1520_vm6, %v3119_v52, %v1517_v8  ;;  %v1530_v32 = vsub.f32 1.0, %v1529_v9  ;;  %3126 = vrcp.f32 %v3707_v49  ;;  %v3733_v57 = vpop.xlane.xlu0 %1397  ;;  %v1544_v19 = vmul.f32 %v3730_v4, %v3686_v56 }
 0x1a7   : > { %v1571_v30 = vsel %vm1568_vm8, %v1570_v61, %v1566_v45  ;;  %v1526_v39 = vsel %vm1523_vm9, %v1525_v20, %v1521_v51  ;;  %3128 = vrcp.f32 %v3733_v57  ;;  %vm1549_vm12 = vweird.f32 %v3730_v4  ;;  %v295_v45 = vld [vmem:[%s3644_s24 + $0x34] sm:$0xf] }
 0x1a8   : > { %v1531_v3 = vmul.f32 %v3702_v37, %v1530_v32  ;;  %v1545_v10 = vsub.f32 1.0, %v1544_v19  ;;  %v1527_v60 = vmul.f32 %v3499_v27, %v1526_v39  ;;  %v1572_v5 = vmul.f32 %v3502_v34, %v1571_v30  ;;  %vm3783_vm15 = vmor %vm1548_vm14, %vm1549_vm12 }
 0x1a9   : > { %v1552_v8 = vand.u32 2147483647, %v3686_v56  ;;  %v1582_v61 = vand.u32 2147483647, %v3721_v63  ;;  %v1584_v51 = vand.u32 2147483648, %v3721_v63  ;;  %vm1538_vm0 = vcmp.eq.f32.partialorder %v1537_v7, 8.507059e+37 }
 0x1aa   : > { %v1546_v14 = vmul.f32 %v3730_v4, %v1545_v10  ;;  %v1532_v12 = vadd.f32 %v3702_v37, %v1531_v3  ;;  %2979 = vmatmul.msk.f32.vlgmr.msra.gmra.mxu3 %vm1948_vm7, %v1527_v60  ;;  %2985 = vmatmul.msk.f32.vlgmr.msrb.gmra.mxu2 %vm1948_vm7, %v1572_v5  ;;  %v1540_v30 = vor.u32 1.1754944e-38, %v1539_v36  ;;  %v1555_v39 = vor.u32 1.1754944e-38, %v1554_v38 }
 0x1ab   : > { %v3739_v52 = vpop.eup %3124  ;;  %2994 = vmatpush.msk.msra.mxu3 %vm1952_vm2, %v293_v40  ;;  %vm1553_vm1 = vcmp.eq.f32.partialorder %v1552_v8, 8.507059e+37  ;;  %v1585_v5 = vor.u32 1.1754944e-38, %v1584_v51  ;;  %vm3808_vm4 = vcmp.eq.f32.partialorder %v1582_v61, 8.507059e+37  ;;  %vm1593_vm8 = vweird.f32 %v3733_v57 }
 0x1ac   : > { %v3746_v59 = vpop.eup %3126  ;;  %v1574_v16 = vmul.f32 %v3739_v52, %v3721_v63  ;;  %v3752_v29 = vpop.xlane.xlu2 %1406  ;;  %v1547_v27 = vadd.f32 %v3730_v4, %v1546_v14  ;;  %v1536_v56 = vsel %vm3775_vm13, %v3702_v37, %v1532_v12  ;;  %v1612_v12 = vand.u32 2147483647, %v3707_v49 }
 0x1ad   : > { %v1604_v34 = vmul.f32 %v3746_v59, %v3707_v49  ;;  %3130 = vrcp.f32 %v3752_v29  ;;  %v3766_v22 = vpop.xlane.xlu1 %1403  ;;  %v3769_v11 = vpop.eup %3128  ;;  %v1541_v37 = vsel %vm1538_vm0, %v1540_v30, %v1536_v56  ;;  %vm1579_vm6 = vweird.f32 %v3739_v52 }
 0x1ae   : > { %v1575_v9 = vsub.f32 1.0, %v1574_v16  ;;  %v1589_v24 = vmul.f32 %v3769_v11, %v3733_v57  ;;  %v3791_v20 = vpop.xlane.xlu0 %1418  ;;  %v1551_v32 = vsel %vm3783_vm15, %v3730_v4, %v1547_v27  ;;  %3132 = vrcp.f32 %v3766_v22  ;;  %vm3842_vm10 = vmor %vm1578_vm3, %vm1579_vm6 }
 0x1af   : > { %v1605_v19 = vsub.f32 1.0, %v1604_v34  ;;  %3134 = vrcp.f32 %v3791_v20  ;;  %v1556_v60 = vsel %vm1553_vm1, %v1555_v39, %v1551_v32  ;;  %v1614_v34 = vand.u32 2147483648, %v3707_v49 }
 0x1b0   : > { %v1590_v3 = vsub.f32 1.0, %v1589_v24  ;;  %v1576_v10 = vmul.f32 %v3739_v52, %v1575_v9  ;;  %vm1594_vm9 = vweird.f32 %v3769_v11  ;;  %v1542_v50 = vmul.f32 %v3513_v53, %v1541_v37  ;;  %v294_v9 = vld [vmem:[%s3644_s24 + $0x30] sm:$0xf] }
 0x1b1   : > { %v1606_v16 = vmul.f32 %v3746_v59, %v1605_v19  ;;  %v1557_v8 = vmul.f32 %v3510_v48, %v1556_v60  ;;  %v1597_v61 = vand.u32 2147483647, %v3733_v57  ;;  %v1599_v51 = vand.u32 2147483648, %v3733_v57  ;;  %vm3858_vm13 = vmor %vm1593_vm8, %vm1594_vm9 }
 0x1b2   : > { %v1591_v4 = vmul.f32 %v3769_v11, %v1590_v3  ;;  %v1577_v36 = vadd.f32 %v3739_v52, %v1576_v10  ;;  %vm1609_vm11 = vweird.f32 %v3746_v59  ;;  %vm3848_vm12 = vcmp.eq.f32.partialorder %v1612_v12, 8.507059e+37  ;;  %2981 = vmatmul.msk.f32.vlgmr.msrb.gmra.mxu0 %vm1948_vm7, %v1542_v50 }
 0x1b3   : > { %v3803_v14 = vpop.eup %3130  ;;  %v1607_v53 = vadd.f32 %v3746_v59, %v1606_v16  ;;  %2983 = vmatmul.msk.f32.vlgmr.msrb.gmra.mxu1 %vm1948_vm7, %v1557_v8  ;;  %v1615_v39 = vor.u32 1.1754944e-38, %v1614_v34  ;;  %v1642_v3 = vand.u32 2147483647, %v3752_v29  ;;  %2996 = vmatpush.msk.msrb.mxu0 %vm1952_vm2, %v294_v9  ;;  %v1644_v16 = vand.u32 2147483648, %v3752_v29  ;;  %vm3881_vm14 = vmor %vm1608_vm5, %vm1609_vm11 }
 0x1b4   : > { %v3806_v41 = vpop.xlane.xlu2 %1412  ;;  %v1634_v27 = vmul.f32 %v3803_v14, %v3752_v29  ;;  %v3821_v7 = vpop.eup %3132  ;;  %v1592_v38 = vadd.f32 %v3769_v11, %v1591_v4  ;;  %2998 = vmatpush.msk.msrb.mxu1 %vm1952_vm2, %v295_v45  ;;  %v1581_v57 = vsel %vm3842_vm10, %v3739_v52, %v1577_v36  ;;  %vm1598_vm15 = vcmp.eq.f32.partialorder %v1597_v61, 8.507059e+37 }
 0x1b5   : > { %v1619_v24 = vmul.f32 %v3821_v7, %v3766_v22  ;;  %3136 = vrcp.f32 %v3806_v41  ;;  %v3834_v56 = vpop.xlane.xlu1 %1409  ;;  %v3836_v32 = vpop.eup %3134  ;;  %vm1638_vm0 = vweird.f32 %v3752_v29  ;;  %v1627_v52 = vand.u32 2147483647, %v3766_v22 }
 0x1b6   : > { %v1635_v30 = vsub.f32 1.0, %v1634_v27  ;;  %v1694_v37 = vmul.f32 %v3836_v32, %v3791_v20  ;;  %v3865_v60 = vpop.xlane.xlu0 %1424  ;;  %v1596_v4 = vsel %vm3858_vm13, %v3769_v11, %v1592_v38  ;;  %3138 = vrcp.f32 %v3834_v56 }
 0x1b7   : > { %v1620_v10 = vsub.f32 1.0, %v1619_v24  ;;  %v1600_v27 = vor.u32 1.1754944e-38, %v1599_v51  ;;  %v1611_v11 = vsel %vm3881_vm14, %v3746_v59, %v1607_v53  ;;  %3140 = vrcp.f32 %v3865_v60 }
 0x1b8   : > { %v1636_v34 = vmul.f32 %v3803_v14, %v1635_v30  ;;  %v1586_v38 = vsel %vm3808_vm4, %v1585_v5, %v1581_v57  ;;  %v1629_v8 = vand.u32 2147483648, %v3766_v22  ;;  %v1695_v9 = vsub.f32 1.0, %v1694_v37 }
 0x1b9   : > { %v1621_v36 = vmul.f32 %v3821_v7, %v1620_v10  ;;  %v1601_v50 = vsel %vm1598_vm15, %v1600_v27, %v1596_v4  ;;  %vm3900_vm1 = vcmp.eq.f32.partialorder %v1642_v3, 8.507059e+37  ;;  %v1645_v61 = vor.u32 1.1754944e-38, %v1644_v16  ;;  %v296_v4 = vld [vmem:[%s3644_s24 + $0x38] sm:$0xf] }
 0x1ba   : > { %vm1623_vm3 = vweird.f32 %v3766_v22  ;;  %v1702_v51 = vand.u32 2147483647, %v3791_v20  ;;  %v1616_v40 = vsel %vm3848_vm12, %v1615_v39, %v1611_v11  ;;  %vm1639_vm4 = vweird.f32 %v3803_v14  ;;  %v297_v39 = vld [vmem:[%s3644_s24 + $0x3c] sm:$0xf]  ;;  %3000 = vmatpush.msk.msrb.mxu2 %vm1952_vm2, %v296_v4 }
 0x1bb   : > { %v3893_v49 = vpop.eup %3136  ;;  %vm1624_vm5 = vweird.f32 %v3821_v7  ;;  %vm1698_vm6 = vweird.f32 %v3791_v20  ;;  %v1637_v48 = vadd.f32 %v3803_v14, %v1636_v34  ;;  %v1622_v53 = vadd.f32 %v3821_v7, %v1621_v36  ;;  %vm3936_vm9 = vmor %vm1638_vm0, %vm1639_vm4 }
 0x1bc   : > { %v3898_v45 = vpop.xlane.xlu2 %1415  ;;  %v1664_v5 = vmul.f32 %v3893_v49, %v3806_v41  ;;  %v3913_v24 = vpop.eup %3138  ;;  %v1587_v30 = vmul.f32 %v3520_v0, %v1586_v38  ;;  %v1602_v19 = vmul.f32 %v3523_v1, %v1601_v50  ;;  %vm3920_vm8 = vcmp.eq.f32.partialorder %v1627_v52, 8.507059e+37  ;;  %vm3950_vm11 = vmor %vm1623_vm3, %vm1624_vm5 }
 0x1bd   : > { %v1630_v3 = vor.u32 1.1754944e-38, %v1629_v8  ;;  %v1696_v10 = vmul.f32 %v3836_v32, %v1695_v9  ;;  %v1649_v37 = vmul.f32 %v3913_v24, %v3834_v56  ;;  %v3927_v57 = vpop.xlane.xlu1 %1430  ;;  %v3930_v16 = vpop.eup %3140  ;;  %vm1699_vm10 = vweird.f32 %v3836_v32  ;;  %v299_v9 = vld [vmem:[%s3644_s24 + $0x44] sm:$0xf] }
 0x1be   : > { %v1704_v1 = vand.u32 2147483648, %v3791_v20  ;;  %v1674_v12 = vand.u32 2147483648, %v3806_v41  ;;  %2987 = vmatmul.msk.f32.vlgmr.msrb.gmra.mxu3 %vm1948_vm7, %v1587_v30  ;;  %2989 = vmatmul.msk.f32.vlgmr.msra.gmra.mxu0 %vm1948_vm7, %v1602_v19  ;;  %v1617_v27 = vmul.f32 %v3525_v2, %v1616_v40  ;;  %vm3954_vm12 = vcmp.eq.f32.partialorder %v1702_v51, 8.507059e+37  ;;  %v3972_v8 = vpop.xlane.xlu0 %1427  ;;  %vm3996_vm15 = vmor %vm1698_vm6, %vm1699_vm10 }
 0x1bf   : > { %v1665_v11 = vsub.f32 1.0, %v1664_v5  ;;  %v1650_v34 = vsub.f32 1.0, %v1649_v37  ;;  %v1724_v36 = vmul.f32 %v3930_v16, %v3865_v60  ;;  %3142 = vrcp.f32 %v3898_v45  ;;  %3002 = vmatpush.msk.msrb.mxu3 %vm1952_vm2, %v297_v39 }
 0x1c0   : > { %v1641_v2 = vsel %vm3936_vm9, %v3803_v14, %v1637_v48  ;;  %v1626_v22 = vsel %vm3950_vm11, %v3821_v7, %v1622_v53  ;;  %v1672_v38 = vand.u32 2147483647, %v3806_v41  ;;  %v1657_v50 = vand.u32 2147483647, %v3834_v56  ;;  %2991 = vmatmul.msk.f32.vlgmr.msra.gmra.mxu1 %vm1948_vm7, %v1617_v27 }
 0x1c1   : > { %v1697_v51 = vadd.f32 %v3836_v32, %v1696_v10  ;;  %v1651_v40 = vmul.f32 %v3913_v24, %v1650_v34  ;;  %v1725_v5 = vsub.f32 1.0, %v1724_v36  ;;  %3144 = vrcp.f32 %v3927_v57  ;;  %3006 = vmatpush.msk.msra.mxu1 %vm1952_vm2, %v299_v9 }
 0x1c2   : > { %v1705_v14 = vor.u32 1.1754944e-38, %v1704_v1  ;;  %vm1668_vm13 = vweird.f32 %v3806_v41  ;;  %vm1653_vm14 = vweird.f32 %v3834_v56  ;;  %v1659_v7 = vand.u32 2147483648, %v3834_v56  ;;  %v298_v56 = vld [vmem:[%s3644_s24 + $0x40] sm:$0xf] }
 0x1c3   : > { %v1646_v48 = vsel %vm3900_vm1, %v1645_v61, %v1641_v2  ;;  %v1666_v53 = vmul.f32 %v3893_v49, %v1665_v11  ;;  %v3985_v30 = vor.u32 1.1754944e-38, %v1674_v12  ;;  %v1732_v19 = vand.u32 2147483647, %v3865_v60  ;;  %v301_v2 = vld [vmem:[%s3644_s24 + $0x4c] sm:$0xf]  ;;  %3004 = vmatpush.msk.msra.mxu0 %vm1952_vm2, %v298_v56 }
 0x1c4   : > { %v3988_v39 = vpop.xlane.xlu2 %1421  ;;  %v1631_v10 = vsel %vm3920_vm8, %v1630_v3, %v1626_v22  ;;  %vm4000_vm0 = vcmp.eq.f32.partialorder %v1657_v50, 8.507059e+37  ;;  %v1734_v61 = vand.u32 2147483648, %v3865_v60  ;;  %3146 = vrcp.f32 %v3972_v8 }
 0x1c5   : > { %v4006_v4 = vpop.eup %3142  ;;  %v1701_v63 = vsel %vm3996_vm15, %v3836_v32, %v1697_v51  ;;  %vm4011_vm1 = vcmp.eq.f32.partialorder %v1672_v38, 8.507059e+37  ;;  %v1652_v3 = vadd.f32 %v3913_v24, %v1651_v40  ;;  %vm1654_vm3 = vweird.f32 %v3913_v24  ;;  %v4031_v36 = vpop.xlane.xlu1 %1436 }
 0x1c6   : > { %v1726_v0 = vmul.f32 %v3930_v16, %v1725_v5  ;;  %vm1669_vm4 = vweird.f32 %v3893_v49  ;;  %v1660_v1 = vor.u32 1.1754944e-38, %v1659_v7  ;;  %vm1728_vm5 = vweird.f32 %v3865_v60  ;;  %vm4040_vm8 = vmor %vm1653_vm14, %vm1654_vm3  ;;  %v302_v5 = vld [vmem:[%s3644_s24 + $0x50] sm:$0xf] }
 0x1c7   : > { %v1679_v12 = vmul.f32 %v4006_v4, %v3898_v45  ;;  %v4022_v32 = vpop.eup %3144  ;;  %v1667_v27 = vadd.f32 %v3893_v49, %v1666_v53  ;;  %vm4025_vm6 = vcmp.eq.f32.partialorder %v1732_v19, 8.507059e+37  ;;  %v1632_v11 = vmul.f32 %v3540_v26, %v1631_v10  ;;  %vm4062_vm10 = vmor %vm1668_vm13, %vm1669_vm4 }
 0x1c8   : > { %v1647_v34 = vmul.f32 %v3535_v15, %v1646_v48  ;;  %v4036_v22 = vsel %vm3954_vm12, %v1705_v14, %v1701_v63  ;;  %vm1729_vm9 = vweird.f32 %v3930_v16  ;;  %v1735_v50 = vor.u32 1.1754944e-38, %v1734_v61  ;;  %v300_v15 = vld [vmem:[%s3644_s24 + $0x48] sm:$0xf]  ;;  %v4069_v48 = vpop.xlane.xlu0 %1433 }
 0x1c9   : > { %v1754_v26 = vmul.f32 %v4022_v32, %v3927_v57  ;;  %v1656_v9 = vsel %vm4040_vm8, %v3913_v24, %v1652_v3  ;;  %v1727_v52 = vadd.f32 %v3930_v16, %v1726_v0  ;;  %v1680_v51 = vsub.f32 1.0, %v1679_v12  ;;  %2993 = vmatmul.msk.f32.vlgmr.msra.gmra.mxu2 %vm1948_vm7, %v1632_v11  ;;  %vm4088_vm12 = vmor %vm1728_vm5, %vm1729_vm9 }
 0x1ca   : > { %2995 = vmatmul.msk.f32.vlgmr.msra.gmra.mxu3 %vm1948_vm7, %v1647_v34  ;;  %3148 = vrcp.f32 %v3988_v39  ;;  %v4056_v40 = vpop.eup %3146  ;;  %v1687_v24 = vand.u32 2147483647, %v3898_v45  ;;  %v1689_v14 = vand.u32 2147483648, %v3898_v45  ;;  %3008 = vmatpush.msk.msra.mxu2 %vm1952_vm2, %v300_v15  ;;  %v1671_v41 = vsel %vm4062_vm10, %v3893_v49, %v1667_v27 }
 0x1cb   : > { %v1755_v7 = vsub.f32 1.0, %v1754_v26  ;;  %3150 = vrcp.f32 %v4031_v36  ;;  %3010 = vmatpush.msk.msra.mxu3 %vm1952_vm2, %v301_v2  ;;  %vm1683_vm11 = vweird.f32 %v3898_v45  ;;  %v1764_v53 = vand.u32 2147483648, %v3927_v57 }
 0x1cc   : > { %v1739_v19 = vmul.f32 %v4056_v40, %v3972_v8  ;;  %v1749_v10 = vand.u32 2147483648, %v3972_v8  ;;  %v1661_v37 = vsel %vm4000_vm0, %v1660_v1, %v1656_v9  ;;  %vm1758_vm13 = vweird.f32 %v3927_v57  ;;  %v4100_v60 = vpop.xlane.xlu2 %1442 }
 0x1cd   : > { %v1762_v61 = vand.u32 2147483647, %v3927_v57  ;;  %v1747_v63 = vand.u32 2147483647, %v3972_v8  ;;  %v1731_v3 = vsel %vm4088_vm12, %v3930_v16, %v1727_v52  ;;  %v1681_v59 = vmul.f32 %v4006_v4, %v1680_v51 }
 0x1ce   : > { %v1740_v0 = vsub.f32 1.0, %v1739_v19  ;;  %3152 = vrcp.f32 %v4069_v48  ;;  %v1676_v1 = vsel %vm4011_vm1, %v3985_v30, %v1671_v41  ;;  %v1690_v12 = vor.u32 1.1754944e-38, %v1689_v14  ;;  %v4146_v41 = vpop.xlane.xlu1 %1439  ;;  %v305_v19 = vld [vmem:[%s3644_s24 + $0x5c] sm:$0xf] }
 0x1cf   : > { %v1756_v27 = vmul.f32 %v4022_v32, %v1755_v7  ;;  %vm1743_vm14 = vweird.f32 %v3972_v8  ;;  %vm1684_vm15 = vweird.f32 %v4006_v4  ;;  %vm4110_vm0 = vcmp.eq.f32.partialorder %v1687_v24, 8.507059e+37 }
 0x1d0   : > { %v4107_v11 = vpop.eup %3148  ;;  %v1765_v34 = vor.u32 1.1754944e-38, %v1764_v53  ;;  %v1741_v2 = vmul.f32 %v4056_v40, %v1740_v0  ;;  %v4115_v38 = vor.u32 1.1754944e-38, %v1749_v10  ;;  %v4121_v20 = vsel %vm4025_vm6, %v1735_v50, %v1731_v3  ;;  %v303_v53 = vld [vmem:[%s3644_s24 + $0x54] sm:$0xf]  ;;  %vm4160_vm6 = vmor %vm1683_vm11, %vm1684_vm15  ;;  %v4185_v0 = vpop.xlane.xlu0 %1454 }
 0x1d1   : > { %v4117_v30 = vpop.eup %3150  ;;  %vm1759_vm1 = vweird.f32 %v4022_v32  ;;  %vm4124_vm3 = vcmp.eq.f32.partialorder %v1762_v61, 8.507059e+37  ;;  %v1709_v15 = vmul.f32 %v4107_v11, %v3988_v39  ;;  %v1662_v9 = vmul.f32 %v3556_v54, %v1661_v37 }
 0x1d2   : > { %v1682_v52 = vadd.f32 %v4006_v4, %v1681_v59  ;;  %vm4132_vm4 = vcmp.eq.f32.partialorder %v1747_v63, 8.507059e+37  ;;  %v1717_v29 = vand.u32 2147483647, %v3988_v39  ;;  %v1719_v50 = vand.u32 2147483648, %v3988_v39  ;;  %vm4178_vm9 = vmor %vm1758_vm13, %vm1759_vm1 }
 0x1d3   : > { %v1784_v56 = vmul.f32 %v4117_v30, %v4031_v36  ;;  %v1757_v24 = vadd.f32 %v4022_v32, %v1756_v27  ;;  %v1710_v14 = vsub.f32 1.0, %v1709_v15  ;;  %2997 = vmatmul.msk.f32.vlgmr.msrb.gmra.mxu0 %vm1948_vm7, %v1662_v9  ;;  %v1677_v54 = vmul.f32 %v3551_v46, %v1676_v1 }
 0x1d4   : > { %v1707_v7 = vmul.f32 %v3538_v25, %v4036_v22  ;;  %v4150_v10 = vpop.eup %3152  ;;  %v1742_v37 = vadd.f32 %v4056_v40, %v1741_v2  ;;  %vm1744_vm5 = vweird.f32 %v4056_v40  ;;  %3154 = vrcp.f32 %v4100_v60  ;;  %3012 = vmatpush.msk.msrb.mxu0 %vm1952_vm2, %v302_v5  ;;  %v4210_v9 = vpop.xlane.xlu2 %1451 }
 0x1d5   : > { %v1785_v49 = vsub.f32 1.0, %v1784_v56  ;;  %v1711_v46 = vmul.f32 %v4107_v11, %v1710_v14  ;;  %vm1713_vm8 = vweird.f32 %v3988_v39  ;;  %v1792_v22 = vand.u32 2147483647, %v4031_v36  ;;  %2999 = vmatmul.msk.f32.vlgmr.msrb.gmra.mxu1 %vm1948_vm7, %v1677_v54  ;;  %vm4196_vm10 = vmor %vm1743_vm14, %vm1744_vm5 }
 0x1d6   : > { %v1769_v61 = vmul.f32 %v4150_v10, %v4069_v48  ;;  %3003 = vmatmul.msk.f32.vlgmr.msrb.gmra.mxu3 %vm1948_vm7, %v1707_v7  ;;  %v1686_v45 = vsel %vm4160_vm6, %v4006_v4, %v1682_v52  ;;  %v1794_v59 = vand.u32 2147483648, %v4031_v36  ;;  %3156 = vrcp.f32 %v4146_v41  ;;  %3014 = vmatpush.msk.msrb.mxu1 %vm1952_vm2, %v303_v53 }
 0x1d7   : > { %v1786_v3 = vmul.f32 %v4117_v30, %v1785_v49  ;;  %3018 = vmatpush.msk.msrb.mxu3 %vm1952_vm2, %v305_v19  ;;  %v1761_v57 = vsel %vm4178_vm9, %v4022_v32, %v1757_v24  ;;  %vm1788_vm11 = vweird.f32 %v4031_v36  ;;  %v1779_v27 = vand.u32 2147483648, %v4069_v48  ;;  %v304_v19 = vld [vmem:[%s3644_s24 + $0x58] sm:$0xf] }
 0x1d8   : > { %v1770_v1 = vsub.f32 1.0, %v1769_v61  ;;  %v1746_v2 = vsel %vm4196_vm10, %v4056_v40, %v1742_v37  ;;  %vm4205_vm12 = vcmp.eq.f32.partialorder %v1717_v29, 8.507059e+37  ;;  %v1720_v32 = vor.u32 1.1754944e-38, %v1719_v50 }
 0x1d9   : > { %v1777_v8 = vand.u32 2147483647, %v4069_v48  ;;  %v1691_v52 = vsel %vm4110_vm0, %v1690_v12, %v1686_v45  ;;  %v1712_v56 = vadd.f32 %v4107_v11, %v1711_v46  ;;  %vm1714_vm13 = vweird.f32 %v4107_v11  ;;  %v4275_v46 = vpop.xlane.xlu1 %1445 }
 0x1da   : > { %vm4216_vm14 = vcmp.eq.f32.partialorder %v1792_v22, 8.507059e+37  ;;  %vm1773_vm15 = vweird.f32 %v4069_v48  ;;  %3158 = vrcp.f32 %v4185_v0  ;;  %v4222_v40 = vpop.eup %3154  ;;  %v1766_v29 = vsel %vm4124_vm3, %v1765_v34, %v1761_v57  ;;  %vm4240_vm1 = vmor %vm1713_vm8, %vm1714_vm13  ;;  %v309_v22 = vld [vmem:[%s3644_s24 + $0x6c] sm:$0xf] }
 0x1db   : > { %v1787_v12 = vadd.f32 %v4117_v30, %v1786_v3  ;;  %vm1789_vm0 = vweird.f32 %v4117_v30  ;;  %v1795_v16 = vor.u32 1.1754944e-38, %v1794_v59  ;;  %v1751_v50 = vsel %vm4132_vm4, %v4115_v38, %v1746_v2 }
 0x1dc   : > { %v1771_v24 = vmul.f32 %v4150_v10, %v1770_v1  ;;  %v4232_v14 = vor.u32 1.1754944e-38, %v1779_v27  ;;  %v1814_v54 = vmul.f32 %v4222_v40, %v4100_v60  ;;  %v4236_v7 = vpop.eup %3156  ;;  %v1822_v26 = vand.u32 2147483647, %v4100_v60  ;;  %vm4255_vm3 = vmor %vm1788_vm11, %vm1789_vm0  ;;  %v4331_v34 = vpop.xlane.xlu0 %1463 }
 0x1dd   : > { %v1824_v51 = vand.u32 2147483648, %v4100_v60  ;;  %v1692_v38 = vmul.f32 %v3565_v33, %v1691_v52  ;;  %v1737_v53 = vmul.f32 %v3553_v47, %v4121_v20  ;;  %v1716_v37 = vsel %vm4240_vm1, %v4107_v11, %v1712_v56  ;;  %v4318_v52 = vpop.xlane.xlu2 %1448 }
 0x1de   : > { %vm4259_vm4 = vcmp.eq.f32.partialorder %v1777_v8, 8.507059e+37  ;;  %v1815_v33 = vsub.f32 1.0, %v1814_v54  ;;  %vm1818_vm5 = vweird.f32 %v4100_v60  ;;  %v1799_v47 = vmul.f32 %v4236_v7, %v4146_v41 }
 0x1df   : > { %v1809_v20 = vand.u32 2147483648, %v4146_v41  ;;  %v1791_v36 = vsel %vm4255_vm3, %v4117_v30, %v1787_v12  ;;  %vm1774_vm6 = vweird.f32 %v4150_v10  ;;  %v1807_v11 = vand.u32 2147483647, %v4146_v41  ;;  %3001 = vmatmul.msk.f32.vlgmr.msrb.gmra.mxu2 %vm1948_vm7, %v1692_v38  ;;  %3007 = vmatmul.msk.f32.vlgmr.msra.gmra.mxu1 %vm1948_vm7, %v1737_v53  ;;  %v306_v12 = vld [vmem:[%s3644_s24 + $0x60] sm:$0xf] }
 0x1e0   : > { %v1767_v25 = vmul.f32 %v3570_v6, %v1766_v29  ;;  %v4278_v61 = vpop.eup %3158  ;;  %v1772_v45 = vadd.f32 %v4150_v10, %v1771_v24  ;;  %v1816_v63 = vmul.f32 %v4222_v40, %v1815_v33  ;;  %v1800_v30 = vsub.f32 1.0, %v1799_v47  ;;  %3016 = vmatpush.msk.msrb.mxu2 %vm1952_vm2, %v304_v19  ;;  %vm4308_vm10 = vmor %vm1773_vm15, %vm1774_vm6 }
 0x1e1   : > { %3160 = vrcp.f32 %v4210_v9  ;;  %v1721_v3 = vsel %vm4205_vm12, %v1720_v32, %v1716_v37  ;;  %v4286_v59 = vor.u32 1.1754944e-38, %v1824_v51  ;;  %vm1803_vm8 = vweird.f32 %v4146_v41 }
 0x1e2   : > { %v1874_v6 = vmul.f32 %v4278_v61, %v4185_v0  ;;  %3011 = vmatmul.msk.f32.vlgmr.msra.gmra.mxu3 %vm1948_vm7, %v1767_v25  ;;  %vm4292_vm9 = vcmp.eq.f32.partialorder %v1822_v26, 8.507059e+37  ;;  %v1801_v4 = vmul.f32 %v4236_v7, %v1800_v30  ;;  %v4297_v1 = vor.u32 1.1754944e-38, %v1809_v20  ;;  %v308_v26 = vld [vmem:[%s3644_s24 + $0x68] sm:$0xf] }
 0x1e3   : > { %v1882_v27 = vand.u32 2147483647, %v4185_v0  ;;  %3162 = vrcp.f32 %v4275_v46  ;;  %3026 = vmatpush.msk.msra.mxu3 %vm1952_vm2, %v309_v22  ;;  %v1796_v2 = vsel %vm4216_vm14, %v1795_v16, %v1791_v36  ;;  %vm1819_vm11 = vweird.f32 %v4222_v40  ;;  %v4384_v36 = vpop.xlane.xlu1 %1466 }
 0x1e4   : > { %vm4313_vm12 = vcmp.eq.f32.partialorder %v1807_v11, 8.507059e+37  ;;  %v1875_v8 = vsub.f32 1.0, %v1874_v6  ;;  %vm1878_vm13 = vweird.f32 %v4185_v0  ;;  %v1776_v48 = vsel %vm4308_vm10, %v4150_v10, %v1772_v45  ;;  %v307_v10 = vld [vmem:[%s3644_s24 + $0x64] sm:$0xf]  ;;  %vm4353_vm0 = vmor %vm1818_vm5, %vm1819_vm11 }
 0x1e5   : > { %v1817_v56 = vadd.f32 %v4222_v40, %v1816_v63  ;;  %v1884_v5 = vand.u32 2147483648, %v4185_v0  ;;  %v1722_v29 = vmul.f32 %v3579_v42, %v1721_v3  ;;  %v1802_v16 = vadd.f32 %v4236_v7, %v1801_v4  ;;  %3022 = vmatpush.msk.msra.mxu1 %vm1952_vm2, %v307_v10 }
 0x1e6   : > { %vm1804_vm14 = vweird.f32 %v4236_v7  ;;  %v1876_v24 = vmul.f32 %v4278_v61, %v1875_v8  ;;  %v1752_v54 = vmul.f32 %v3568_v35, %v1751_v50  ;;  %vm4337_vm15 = vcmp.eq.f32.partialorder %v1882_v27, 8.507059e+37  ;;  %v310_v50 = vld [vmem:[%s3644_s24 + $0x70] sm:$0xf] }
 0x1e7   : > { %v4335_v51 = vpop.eup %3160  ;;  %v1869_v42 = vand.u32 2147483648, %v4210_v9  ;;  %3005 = vmatmul.msk.f32.vlgmr.msra.gmra.mxu0 %vm1948_vm7, %v1722_v29  ;;  %v1797_v53 = vmul.f32 %v3584_v28, %v1796_v2  ;;  %3164 = vrcp.f32 %v4318_v52  ;;  %v1781_v35 = vsel %vm4259_vm4, %v4232_v14, %v1776_v48  ;;  %v311_v14 = vld [vmem:[%s3644_s24 + $0x74] sm:$0xf]  ;;  %vm4371_vm1 = vmor %vm1803_vm8, %vm1804_vm14  ;;  %v4435_v29 = vpop.xlane.xlu2 %1457 }
 0x1e8   : > { %v1859_v19 = vmul.f32 %v4335_v51, %v4210_v9  ;;  %v1867_v28 = vand.u32 2147483647, %v4210_v9  ;;  %v1837_v37 = vand.u32 2147483647, %v4275_v46  ;;  %3009 = vmatmul.msk.f32.vlgmr.msra.gmra.mxu2 %vm1948_vm7, %v1752_v54  ;;  %3020 = vmatpush.msk.msra.mxu0 %vm1952_vm2, %v306_v12  ;;  %v1821_v60 = vsel %vm4353_vm0, %v4222_v40, %v1817_v56 }
 0x1e9   : > { %v3163_v39 = vpop.eup %3162  ;;  %v1877_v33 = vadd.f32 %v4278_v61, %v1876_v24  ;;  %vm1879_vm3 = vweird.f32 %v4278_v61  ;;  %3015 = vmatmul.msk.f32.vlgmr.msrb.gmra.mxu1 %vm1948_vm7, %v1797_v53  ;;  %3166 = vrcp.f32 %v4331_v34  ;;  %3024 = vmatpush.msk.msra.mxu2 %vm1952_vm2, %v308_v26  ;;  %v1806_v40 = vsel %vm4371_vm1, %v4236_v7, %v1802_v16  ;;  %v312_v24 = vld [vmem:[%s3644_s24 + $0x78] sm:$0xf]  ;;  %v313_v53 = vld [vmem:[%s3644_s24 + $0x7c] sm:$0xf] }
 0x1ea   : > { %v1885_v47 = vor.u32 1.1754944e-38, %v1884_v5  ;;  %v1860_v41 = vsub.f32 1.0, %v1859_v19  ;;  %v1829_v20 = vmul.f32 %v3163_v39, %v4275_v46  ;;  %3030 = vmatpush.msk.msrb.mxu1 %vm1952_vm2, %v311_v14  ;;  %vm1863_vm4 = vweird.f32 %v4210_v9  ;;  %vm4397_vm6 = vmor %vm1878_vm13, %vm1879_vm3 }
 0x1eb   : > { %v1870_v11 = vor.u32 1.1754944e-38, %v1869_v42  ;;  %vm1833_vm5 = vweird.f32 %v4275_v46  ;;  %v1839_v25 = vand.u32 2147483648, %v4275_v46  ;;  %v1826_v22 = vsel %vm4292_vm9, %v4286_v59, %v1821_v60  ;;  %v4446_v42 = vpop.xlane.xlu0 %1460 }
 0x1ec   : > { %v1861_v45 = vmul.f32 %v4335_v51, %v1860_v41  ;;  %vm4402_vm8 = vcmp.eq.f32.partialorder %v1867_v28, 8.507059e+37  ;;  %v1830_v30 = vsub.f32 1.0, %v1829_v20  ;;  %vm4406_vm10 = vcmp.eq.f32.partialorder %v1837_v37, 8.507059e+37 }
 0x1ed   : > { %v3165_v59 = vpop.eup %3164  ;;  %v1811_v0 = vsel %vm4313_vm12, %v4297_v1, %v1806_v40  ;;  %v1881_v6 = vsel %vm4397_vm6, %v4278_v61, %v1877_v33  ;;  %vm1864_vm9 = vweird.f32 %v4335_v51  ;;  %3168 = vrcp.f32 %v4384_v36 }
 0x1ee   : > { %v1862_v57 = vadd.f32 %v4335_v51, %v1861_v45  ;;  %v1831_v4 = vmul.f32 %v3163_v39, %v1830_v30  ;;  %vm1834_vm11 = vweird.f32 %v3163_v39  ;;  %v1844_v27 = vmul.f32 %v3165_v59, %v4318_v52  ;;  %vm4429_vm13 = vmor %vm1863_vm4, %vm1864_vm9 }
 0x1ef   : > { %v4420_v2 = vpop.eup %3166  ;;  %v1840_v15 = vor.u32 1.1754944e-38, %v1839_v25  ;;  %vm1848_vm12 = vweird.f32 %v4318_v52  ;;  %v1852_v1 = vand.u32 2147483647, %v4318_v52  ;;  %v1854_v61 = vand.u32 2147483648, %v4318_v52  ;;  %vm1835_vm14 = vmor %vm1833_vm5, %vm1834_vm11 }
 0x1f0   : > { %v1886_v32 = vsel %vm4337_vm15, %v1885_v47, %v1881_v6  ;;  %v1832_v48 = vadd.f32 %v3163_v39, %v1831_v4  ;;  %v1845_v56 = vsub.f32 1.0, %v1844_v27  ;;  %v1919_v5 = vmul.f32 %v4420_v2, %v4331_v34 }
 0x1f1   : > { %v1866_v12 = vsel %vm4429_vm13, %v4335_v51, %v1862_v57  ;;  %vm1849_vm15 = vweird.f32 %v3165_v59  ;;  %v1782_v9 = vmul.f32 %v3582_v21, %v1781_v35  ;;  %v1812_v16 = vmul.f32 %v3597_v23, %v1811_v0 }
 0x1f2   : > { %v1836_v54 = vsel %vm1835_vm14, %v3163_v39, %v1832_v48  ;;  %v1846_v26 = vmul.f32 %v3165_v59, %v1845_v56  ;;  %v1920_v10 = vsub.f32 1.0, %v1919_v5  ;;  %v1827_v38 = vmul.f32 %v3595_v18, %v1826_v22  ;;  %vm1850_vm3 = vmor %vm1848_vm12, %vm1849_vm15 }
 0x1f3   : > { %v3169_v19 = vpop.eup %3168  ;;  %v1841_v46 = vsel %vm4406_vm10, %v1840_v15, %v1836_v54  ;;  %vm4452_vm0 = vcmp.eq.f32.partialorder %v1852_v1, 8.507059e+37  ;;  %v1855_v21 = vor.u32 1.1754944e-38, %v1854_v61  ;;  %3013 = vmatmul.msk.f32.vlgmr.msrb.gmra.mxu0 %vm1948_vm7, %v1782_v9  ;;  %3017 = vmatmul.msk.f32.vlgmr.msrb.gmra.mxu2 %vm1948_vm7, %v1812_v16  ;;  %3170 = vrcp.f32 %v4435_v29 }
 0x1f4   : > { %v1847_v18 = vadd.f32 %v3165_v59, %v1846_v26  ;;  %v1921_v23 = vmul.f32 %v4420_v2, %v1920_v10  ;;  %vm1923_vm1 = vweird.f32 %v4331_v34  ;;  %v1934_v35 = vmul.f32 %v3169_v19, %v4384_v36  ;;  %3019 = vmatmul.msk.f32.vlgmr.msrb.gmra.mxu3 %vm1948_vm7, %v1827_v38  ;;  %3032 = vmatpush.msk.msrb.mxu2 %vm1952_vm2, %v312_v24 }
 0x1f5   : > { %v1871_v28 = vsel %vm4402_vm8, %v1870_v11, %v1866_v12  ;;  %vm1924_vm4 = vweird.f32 %v4420_v2  ;;  %v1927_v37 = vand.u32 2147483647, %v4331_v34  ;;  %3172 = vrcp.f32 %v4446_v42  ;;  %3034 = vmatpush.msk.msrb.mxu3 %vm1952_vm2, %v313_v53  ;;  %3028 = vmatpush.msk.msrb.mxu0 %vm1952_vm2, %v310_v50 }
 0x1f6   : > { %v1851_v14 = vsel %vm1850_vm3, %v3165_v59, %v1847_v18  ;;  %v1922_v39 = vadd.f32 %v4420_v2, %v1921_v23  ;;  %v1929_v60 = vand.u32 2147483648, %v4331_v34  ;;  %v1935_v49 = vsub.f32 1.0, %v1934_v35  ;;  %vm4483_vm5 = vmor %vm1923_vm1, %vm1924_vm4 }
 0x1f7   : > { %v1856_v52 = vsel %vm4452_vm0, %v1855_v21, %v1851_v14  ;;  %v1942_v33 = vand.u32 2147483647, %v4384_v36  ;;  %v1944_v40 = vand.u32 2147483648, %v4384_v36  ;;  %v1842_v47 = vmul.f32 %v3608_v58, %v1841_v46 }
 0x1f8   : > { %v1936_v20 = vmul.f32 %v3169_v19, %v1935_v49  ;;  %vm1939_vm2 = vweird.f32 %v3169_v19  ;;  %v1872_v11 = vmul.f32 %v3611_v62, %v1871_v28  ;;  %v1926_v22 = vsel %vm4483_vm5, %v4420_v2, %v1922_v39 }
 0x1f9   : > { %v3171_v25 = vpop.eup %3170  ;;  %vm1938_vm6 = vweird.f32 %v4384_v36  ;;  %v1857_v7 = vmul.f32 %v3620_v31, %v1856_v52  ;;  %v1930_v58 = vor.u32 1.1754944e-38, %v1929_v60  ;;  %v1887_v63 = vmul.f32 %v3602_v55, %v1886_v32 }
 0x1fa   : > { %v1937_v45 = vadd.f32 %v3169_v19, %v1936_v20  ;;  %v1889_v34 = vmul.f32 %v3171_v25, %v4435_v29  ;;  %vm1928_vm8 = vcmp.eq.f32.partialorder %v1927_v37, 8.507059e+37  ;;  %vm1940_vm10 = vmor %vm1938_vm6, %vm1939_vm2  ;;  %vm1943_vm9 = vcmp.eq.f32.partialorder %v1942_v33, 8.507059e+37 }
 0x1fb   : > { %v3173_v30 = vpop.eup %3172  ;;  %v1945_v62 = vor.u32 1.1754944e-38, %v1944_v40  ;;  %3021 = vmatmul.msk.f32.vlgmr.msra.gmra.mxu0 %vm1948_vm7, %v1842_v47  ;;  %3025 = vmatmul.msk.f32.vlgmr.msra.gmra.mxu2 %vm1948_vm7, %v1872_v11  ;;  %v1931_v3 = vsel %vm1928_vm8, %v1930_v58, %v1926_v22  ;;  %v1899_v55 = vand.u32 2147483648, %v4435_v29  ;;  %vm1894_vm11 = vweird.f32 %v3171_v25 }
 0x1fc   : > { %v1941_v59 = vsel %vm1940_vm10, %v3169_v19, %v1937_v45  ;;  %v1890_v36 = vsub.f32 1.0, %v1889_v34  ;;  %v1904_v31 = vmul.f32 %v3173_v30, %v4446_v42  ;;  %3027 = vmatmul.msk.f32.vlgmr.msra.gmra.mxu3 %vm1948_vm7, %v1887_v63  ;;  %3023 = vmatmul.msk.f32.vlgmr.msra.gmra.mxu1 %vm1948_vm7, %v1857_v7  ;;  %v1897_v57 = vand.u32 2147483647, %v4435_v29 }
 0x1fd   : > { %v1946_v0 = vsel %vm1943_vm9, %v1945_v62, %v1941_v59  ;;  %vm1893_vm12 = vweird.f32 %v4435_v29  ;;  %v1912_v27 = vand.u32 2147483647, %v4446_v42  ;;  %v1914_v2 = vand.u32 2147483648, %v4446_v42 }
 0x1fe   : > { %v1891_v6 = vmul.f32 %v3171_v25, %v1890_v36  ;;  %v1905_v4 = vsub.f32 1.0, %v1904_v31  ;;  %v1932_v15 = vmul.f32 %v3622_v17, %v1931_v3  ;;  %v1947_v1 = vmul.f32 %v3626_v44, %v1946_v0  ;;  %vm1895_vm14 = vmor %vm1893_vm12, %vm1894_vm11 }
 0x1ff   : > { %vm1909_vm13 = vweird.f32 %v3173_v30  ;;  %v1900_v8 = vor.u32 1.1754944e-38, %v1899_v55  ;;  %vm1898_vm15 = vcmp.eq.f32.partialorder %v1897_v57, 8.507059e+37  ;;  %vm1908_vm0 = vweird.f32 %v4446_v42 }
 0x200   : > { %v1892_v61 = vadd.f32 %v3171_v25, %v1891_v6  ;;  %v1906_v32 = vmul.f32 %v3173_v30, %v1905_v4  ;;  %vm1910_vm1 = vmor %vm1908_vm0, %vm1909_vm13  ;;  %v1915_v29 = vor.u32 1.1754944e-38, %v1914_v2  ;;  %vm1913_vm3 = vcmp.eq.f32.partialorder %v1912_v27, 8.507059e+37 }
 0x201   : > { %vm2782_vm4 = vcmask 60416  }
 0x202   : > { %v1896_v48 = vsel %vm1895_vm14, %v3171_v25, %v1892_v61  ;;  %v1907_v56 = vadd.f32 %v3173_v30, %v1906_v32 }
 0x203   : > { %v1901_v5 = vsel %vm1898_vm15, %v1900_v8, %v1896_v48  ;;  %3033 = vmatmul.msk.f32.vlgmr.msrb.gmra.mxu2 %vm1948_vm7, %v1932_v15 }
 0x204   : > { %v1902_v17 = vmul.f32 %v3634_v13, %v1901_v5  ;;  %v1911_v12 = vsel %vm1910_vm1, %v3173_v30, %v1907_v56  ;;  %3035 = vmatmul.msk.f32.vlgmr.msrb.gmra.mxu3 %vm1948_vm7, %v1947_v1 }
 0x205   : > { %v1916_v44 = vsel %vm1913_vm3, %v1915_v29, %v1911_v12 }
 0x206   : > { %v1917_v9 = vmul.f32 %v3632_v43, %v1916_v44  ;;  %3029 = vmatmul.msk.f32.vlgmr.msrb.gmra.mxu0 %vm1948_vm7, %v1902_v17 }
 0x208   : > { %3031 = vmatmul.msk.f32.vlgmr.msrb.gmra.mxu1 %vm1948_vm7, %v1917_v9 }
 0x217   : > { %v1973_v13 = vpop.f32.mrf.mxu0 }
 0x218   : > { %2783 = vst.msk [vmem:[%s4518_s27] sm:$0xf] %vm2782_vm4, %v1973_v13 }
 0x220   : > { %v1999_v43 = vpop.f32.mrf.mxu1 }
 0x221   : > { %2784 = vst.msk [vmem:[%s4518_s27 + $0x4] sm:$0xf] %vm2782_vm4, %v1999_v43 }
 0x225   : > { %v2025_v16 = vpop.f32.mrf.mxu2 }
 0x226   : > { %2785 = vst.msk [vmem:[%s4518_s27 + $0x8] sm:$0xf] %vm2782_vm4, %v2025_v16 }
 0x22d   : > { %v2051_v24 = vpop.f32.mrf.mxu3  ;;  %v2129_v54 = vpop.f32.mrf.mxu2 }
 0x22e   : > { %2786 = vst.msk [vmem:[%s4518_s27 + $0xc] sm:$0xf] %vm2782_vm4, %v2051_v24 }
 0x22f   : > { %2789 = vst.msk [vmem:[%s4518_s27 + $0x18] sm:$0xf] %vm2782_vm4, %v2129_v54  ;;  %v2077_v26 = vpop.f32.mrf.mxu0 }
 0x230   : > { %v2103_v10 = vpop.f32.mrf.mxu1  ;;  %2787 = vst.msk [vmem:[%s4518_s27 + $0x10] sm:$0xf] %vm2782_vm4, %v2077_v26 }
 0x231   : > { %2788 = vst.msk [vmem:[%s4518_s27 + $0x14] sm:$0xf] %vm2782_vm4, %v2103_v10 }
 0x23b   : > { %v2181_v38 = vpop.f32.mrf.mxu0 }
 0x23c   : > { %2791 = vst.msk [vmem:[%s4518_s27 + $0x20] sm:$0xf] %vm2782_vm4, %v2181_v38 }
 0x23d   : > { %v2207_v42 = vpop.f32.mrf.mxu1 }
 0x23e   : > { %2792 = vst.msk [vmem:[%s4518_s27 + $0x24] sm:$0xf] %vm2782_vm4, %v2207_v42 }
 0x241   : > { %v2155_v53 = vpop.f32.mrf.mxu3 }
 0x242   : > { %2790 = vst.msk [vmem:[%s4518_s27 + $0x1c] sm:$0xf] %vm2782_vm4, %v2155_v53 }
 0x24c   : > { %v2233_v50 = vpop.f32.mrf.mxu2 }
 0x24d   : > { %v2259_v19 = vpop.f32.mrf.mxu3  ;;  %2793 = vst.msk [vmem:[%s4518_s27 + $0x28] sm:$0xf] %vm2782_vm4, %v2233_v50 }
 0x24e   : > { %2794 = vst.msk [vmem:[%s4518_s27 + $0x2c] sm:$0xf] %vm2782_vm4, %v2259_v19 }
 0x250   : > { %v2285_v46 = vpop.f32.mrf.mxu0 }
 0x251   : > { %2795 = vst.msk [vmem:[%s4518_s27 + $0x30] sm:$0xf] %vm2782_vm4, %v2285_v46 }
 0x252   : > { %v2311_v51 = vpop.f32.mrf.mxu1 }
 0x253   : > { %2796 = vst.msk [vmem:[%s4518_s27 + $0x34] sm:$0xf] %vm2782_vm4, %v2311_v51 }
 0x259   : > { %v2363_v21 = vpop.f32.mrf.mxu3 }
 0x25a   : > { %2798 = vst.msk [vmem:[%s4518_s27 + $0x3c] sm:$0xf] %vm2782_vm4, %v2363_v21 }
 0x25c   : > { %v2415_v18 = vpop.f32.mrf.mxu1 }
 0x25d   : > { %2800 = vst.msk [vmem:[%s4518_s27 + $0x44] sm:$0xf] %vm2782_vm4, %v2415_v18 }
 0x262   : > { %v2337_v23 = vpop.f32.mrf.mxu2 }
 0x263   : > { %2797 = vst.msk [vmem:[%s4518_s27 + $0x38] sm:$0xf] %vm2782_vm4, %v2337_v23 }
 0x264   : > { %v2389_v35 = vpop.f32.mrf.mxu0 }
 0x265   : > { %v2467_v28 = vpop.f32.mrf.mxu3  ;;  %2799 = vst.msk [vmem:[%s4518_s27 + $0x40] sm:$0xf] %vm2782_vm4, %v2389_v35 }
 0x266   : > { %2802 = vst.msk [vmem:[%s4518_s27 + $0x4c] sm:$0xf] %vm2782_vm4, %v2467_v28  ;;  %v2519_v37 = vpop.f32.mrf.mxu1 }
 0x267   : > { %2804 = vst.msk [vmem:[%s4518_s27 + $0x54] sm:$0xf] %vm2782_vm4, %v2519_v37 }
 0x26b   : > { %v2441_v14 = vpop.f32.mrf.mxu2 }
 0x26c   : > { %2801 = vst.msk [vmem:[%s4518_s27 + $0x48] sm:$0xf] %vm2782_vm4, %v2441_v14 }
 0x270   : > { %v2493_v39 = vpop.f32.mrf.mxu0 }
 0x271   : > { %2803 = vst.msk [vmem:[%s4518_s27 + $0x50] sm:$0xf] %vm2782_vm4, %v2493_v39 }
 0x276   : > { %v2545_v60 = vpop.f32.mrf.mxu2 }
 0x277   : > { %2805 = vst.msk [vmem:[%s4518_s27 + $0x58] sm:$0xf] %vm2782_vm4, %v2545_v60  ;;  %v2571_v49 = vpop.f32.mrf.mxu3 }
 0x278   : > { %2806 = vst.msk [vmem:[%s4518_s27 + $0x5c] sm:$0xf] %vm2782_vm4, %v2571_v49  ;;  %v2597_v52 = vpop.f32.mrf.mxu0 }
 0x279   : > { %2807 = vst.msk [vmem:[%s4518_s27 + $0x60] sm:$0xf] %vm2782_vm4, %v2597_v52  ;;  %v2623_v33 = vpop.f32.mrf.mxu1 }
 0x27a   : > { %2808 = vst.msk [vmem:[%s4518_s27 + $0x64] sm:$0xf] %vm2782_vm4, %v2623_v33 }
 0x27e   : > { %v2649_v40 = vpop.f32.mrf.mxu2 }
 0x27f   : > { %2809 = vst.msk [vmem:[%s4518_s27 + $0x68] sm:$0xf] %vm2782_vm4, %v2649_v40  ;;  %v2675_v47 = vpop.f32.mrf.mxu3 }
 0x280   : > { %2810 = vst.msk [vmem:[%s4518_s27 + $0x6c] sm:$0xf] %vm2782_vm4, %v2675_v47 }
 0x283   : > { %v2701_v41 = vpop.f32.mrf.mxu0 }
 0x284   : > { %2811 = vst.msk [vmem:[%s4518_s27 + $0x70] sm:$0xf] %vm2782_vm4, %v2701_v41 }
 0x285   : > { %v2727_v20 = vpop.f32.mrf.mxu1 }
 0x286   : > { %v2753_v11 = vpop.f32.mrf.mxu2  ;;  %2812 = vst.msk [vmem:[%s4518_s27 + $0x74] sm:$0xf] %vm2782_vm4, %v2727_v20 }
 0x287   : > { %2813 = vst.msk [vmem:[%s4518_s27 + $0x78] sm:$0xf] %vm2782_vm4, %v2753_v11  ;;  %v2779_v25 = vpop.f32.mrf.mxu3 }
 0x288   : > { %2814 = vst.msk [vmem:[%s4518_s27 + $0x7c] sm:$0xf] %vm2782_vm4, %v2779_v25 }
 0x289 PF: > { %s13_s12 = sadd.s32 1, %s3180_s12  }
 0x28a   : > { %p10_p4 = scmp.ge.s32.totalorder %s13_s12, 4  }
 0x28c   :  { %12 = sbr.rel (!%p10_p4) target bundleno = 1 (0x1), region = 68 }

</bundles_post_ra>
